<compile_context>
chip_gen: v6e
topology: v6e:2x2x1
jax: 0.10.0
libtpu: 0.0.40
codegen_flags: <defaults>
</compile_context>

<pallas_src>
import functools

import jax
import jax.numpy as jnp
from jax.experimental import pallas as pl
from jax.experimental.pallas import tpu as pltpu


LANE = 128                      # lane width / feature padding quantum
TM = 512                        # output-row tile
TK = 1024                       # K (source-node) tile; multiple of TM
TN_MAX = 512                    # cap on the output-feature tile width
VMEM_LIMIT = 32 * 1024 * 1024   # explicit, safe on v5e / v6e / v7x

assert TK % TM == 0


def _round_up(n, m):
    return ((n + m - 1) // m) * m


def _pad2(a, rows, cols):
    pr, pc = rows - a.shape[0], cols - a.shape[1]
    if pr or pc:
        a = jnp.pad(a, ((0, pr), (0, pc)))
    return a


# ----------------------------------------------------------------------------
# Kernel 1: dis = deg^-1/2 from row sums of adj.
#   Row sums via MXU: adj_tile(bf16) @ ones(TK,128)(bf16) -> every column of the
#   f32 accumulator holds the row sum; lanes collapsed once at the last K step.
#   Padded (all-zero) rows give rsqrt(0)=inf; they are masked in the wrapper.
# ----------------------------------------------------------------------------
def _deg_rsqrt_kernel(adj_ref, dis_ref, acc_ref):
    k = pl.program_id(1)                 # top level only (interpret-safe)
    last_k = pl.num_programs(1) - 1

    @pl.when(k == 0)
    def _():
        acc_ref[...] = jnp.zeros_like(acc_ref)

    ones = jnp.ones((adj_ref.shape[1], LANE), jnp.bfloat16)
    acc_ref[...] += jnp.dot(adj_ref[...], ones, preferred_element_type=jnp.float32)

    @pl.when(k == last_k)
    def _():
        dis_ref[...] = jax.lax.rsqrt(acc_ref[:, 0:1])


def compute_dis_raw(adj_p):
    np_ = adj_p.shape[0]
    grid = (np_ // TM, np_ // TK)
    return pl.pallas_call(
        _deg_rsqrt_kernel,
        out_shape=jax.ShapeDtypeStruct((np_, 1), jnp.float32),
        grid=grid,
        in_specs=[pl.BlockSpec((TM, TK), lambda i, k: (i, k))],
        out_specs=pl.BlockSpec((TM, 1), lambda i, k: (i, 0)),
        scratch_shapes=[pltpu.VMEM((TM, LANE), jnp.float32)],
        compiler_params=pltpu.CompilerParams(
            dimension_semantics=("parallel", "arbitrary"),
            vmem_limit_bytes=VMEM_LIMIT),
    )(adj_p)


# ----------------------------------------------------------------------------
# Kernel 2: xw = dis ⊙ (x @ W)   (bf16 MXU operands, f32 scale, bf16 output)
# ----------------------------------------------------------------------------
def _xw_kernel(x_ref, w_ref, dis_ref, o_ref):
    xw = jnp.dot(x_ref[...], w_ref[...], preferred_element_type=jnp.float32)
    o_ref[...] = (dis_ref[...] * xw).astype(o_ref.dtype)


def xw_scaled(x, w, dis):
    np_, cp_in = x.shape
    cp_out = w.shape[1]
    grid = (np_ // TM,)
    return pl.pallas_call(
        _xw_kernel,
        out_shape=jax.ShapeDtypeStruct((np_, cp_out), jnp.bfloat16),
        grid=grid,
        in_specs=[
            pl.BlockSpec((TM, cp_in), lambda i: (i, 0)),
            pl.BlockSpec((cp_in, cp_out), lambda i: (0, 0)),
            pl.BlockSpec((TM, 1), lambda i: (i, 0)),
        ],
        out_specs=pl.BlockSpec((TM, cp_out), lambda i: (i, 0)),
        compiler_params=pltpu.CompilerParams(
            dimension_semantics=("parallel",),
            vmem_limit_bytes=VMEM_LIMIT),
    )(x, w, dis)


# ----------------------------------------------------------------------------
# Kernel 3: h = dis_row ⊙ (adj @ xw) + b, optional fused ReLU
#   Tiled (row, out-feature, K) with f32 VMEM accumulator; bf16 MXU operands.
#   With tn == full padded feature width the j axis collapses and adj is
#   streamed from HBM exactly once.
# ----------------------------------------------------------------------------
def _spmm_kernel(adj_ref, xw_ref, dis_ref, b_ref, o_ref, acc_ref, *, apply_relu):
    k = pl.program_id(2)                 # top level only (interpret-safe)
    last_k = pl.num_programs(2) - 1

    @pl.when(k == 0)
    def _():
        acc_ref[...] = jnp.zeros_like(acc_ref)

    acc_ref[...] += jnp.dot(adj_ref[...], xw_ref[...],
                            preferred_element_type=jnp.float32)

    @pl.when(k == last_k)
    def _():
        h = acc_ref[...] * dis_ref[...] + b_ref[...]   # f32 epilogue
        if apply_relu:
            h = jnp.maximum(h, 0.0)
        o_ref[...] = h.astype(o_ref.dtype)


def spmm(adj_p, xw, dis, b2d, *, tn, apply_relu, out_dtype):
    np_ = adj_p.shape[0]
    cp_out = xw.shape[1]
    grid = (np_ // TM, cp_out // tn, np_ // TK)
    return pl.pallas_call(
        functools.partial(_spmm_kernel, apply_relu=apply_relu),
        out_shape=jax.ShapeDtypeStruct((np_, cp_out), out_dtype),
        grid=grid,
        in_specs=[
            pl.BlockSpec((TM, TK), lambda i, j, k: (i, k)),
            pl.BlockSpec((TK, tn), lambda i, j, k: (k, j)),
            pl.BlockSpec((TM, 1), lambda i, j, k: (i, 0)),
            pl.BlockSpec((1, tn), lambda i, j, k: (0, j)),
        ],
        out_specs=pl.BlockSpec((TM, tn), lambda i, j, k: (i, j)),
        scratch_shapes=[pltpu.VMEM((TM, tn), jnp.float32)],
        compiler_params=pltpu.CompilerParams(
            dimension_semantics=("parallel", "parallel", "arbitrary"),
            vmem_limit_bytes=VMEM_LIMIT),
    )(adj_p, xw, dis, b2d)


# ----------------------------------------------------------------------------
# Forward pass
# ----------------------------------------------------------------------------
def gcn_forward(adj, x, params):
    """params: list of (W, b). ReLU (+identity dropout) between layers, not after last."""
    n = adj.shape[0]
    np_ = _round_up(n, TK)                                   # TK is a multiple of TM

    # cast BEFORE padding (halves padded footprint); 0/1 exact in bf16
    adj_p = _pad2(adj.astype(jnp.bfloat16), np_, np_)

    dis_raw = compute_dis_raw(adj_p)                         # [np_,1] f32 (inf on padded rows)
    rows = jnp.arange(np_, dtype=jnp.int32)[:, None]
    dis = jnp.where(rows < n, dis_raw, 0.0)                  # mask padded rows only

    cp_in0 = _round_up(x.shape[1], LANE)
    h = _pad2(x.astype(jnp.bfloat16), np_, cp_in0)           # bf16 MXU operand

    num_layers = len(params)
    for li, (w, b) in enumerate(params):
        c_out = w.shape[1]
        cp_in = h.shape[1]                                   # matches previous padded width
        cp_out = _round_up(c_out, LANE)
        if cp_out > TN_MAX:                                  # keep grid j exact
            cp_out = _round_up(cp_out, TN_MAX)
        tn = min(cp_out, TN_MAX)

        w_p = _pad2(w.astype(jnp.bfloat16), cp_in, cp_out)
        b_p = jnp.pad(b.astype(jnp.float32), (0, cp_out - c_out)).reshape(1, cp_out)

        xw = xw_scaled(h, w_p, dis)                          # [np_, cp_out] bf16
        is_last = (li == num_layers - 1)
        h = spmm(adj_p, xw, dis, b_p, tn=tn,
                 apply_relu=not is_last,
                 out_dtype=jnp.float32 if is_last else jnp.bfloat16)
        # F.dropout(p, training=False) == identity

    c_out_last = params[-1][0].shape[1]
    return h[:n, :c_out_last]


# ----------------------------------------------------------------------------
# Deterministic parameter init (glorot uniform weights, zero bias)
# ----------------------------------------------------------------------------
def make_params(key, in_channels, hidden_channels, out_channels, num_layers):
    dims = [in_channels] + [hidden_channels] * (num_layers - 1) + [out_channels]
    params = []
    for i in range(num_layers):
        fan_in, fan_out = dims[i], dims[i + 1]
        key, sub = jax.random.split(key)
        limit = (6.0 / (fan_in + fan_out)) ** 0.5
        w = jax.random.uniform(sub, (fan_in, fan_out), jnp.float32, -limit, limit)
        b = jnp.zeros((fan_out,), jnp.float32)
        params.append((w, b))
    return params


# ----------------------------------------------------------------------------
# Pure-JAX reference (f32) for a loose sanity check
# ----------------------------------------------------------------------------
def gcn_reference(adj, x, params):
    deg = jnp.sum(adj, axis=1)
    dis = deg ** -0.5
    adj_n = dis[:, None] * adj * dis[None, :]
    h = x
    for i, (w, b) in enumerate(params):
        h = adj_n @ h @ w + b
        if i < len(params) - 1:
            h = jax.nn.relu(h)
    return h


# ----------------------------------------------------------------------------
# Main
# ----------------------------------------------------------------------------
if __name__ == "__main__":
    key = jax.random.PRNGKey(0)
    N, IN_C, HID_C, OUT_C, NUM_LAYERS = 1000, 16, 32, 8, 3   # N exercises row padding

    k_adj, k_x, k_p = jax.random.split(key, 3)

    # symmetric random adjacency with self-loops (keeps degrees > 0, like the driver)
    a = (jax.random.uniform(k_adj, (N, N)) < 0.01).astype(jnp.float32)
    adj = jnp.maximum(a, a.T)
    adj = jnp.maximum(adj, jnp.eye(N, dtype=jnp.float32))

    x = jax.random.normal(k_x, (N, IN_C), jnp.float32)
    params = make_params(k_p, IN_C, HID_C, OUT_C, NUM_LAYERS)

    out = gcn_forward(adj, x, params)
    out = jax.block_until_ready(out)
    assert out.shape == (N, OUT_C)
    assert bool(jnp.all(jnp.isfinite(out)))

    # loose check vs f32 reference (kernel uses bf16 MXU operands throughout)
    ref = gcn_reference(adj, x, params)
    scale = float(jnp.maximum(1.0, jnp.max(jnp.abs(ref))))
    max_err = float(jnp.max(jnp.abs(out - ref)))
    assert max_err <= 0.1 * scale, f"max abs err {max_err} vs scale {scale}"

    print("KERNEL_OK")
</pallas_src>

<mosaic_0001>
module attributes {stable_mosaic.version = 11 : i64} {
  func.func @_deg_rsqrt_kernel(%arg0: i32, %arg1: i32, %arg2: memref<512x1024xbf16, #tpu.memory_space<vmem>>, %arg3: memref<512x1xf32, #tpu.memory_space<vmem>>, %arg4: memref<512x128xf32, #tpu.memory_space<vmem>>) attributes {dimension_semantics = [#tpu.dimension_semantics<parallel>, #tpu.dimension_semantics<arbitrary>], iteration_bounds = array<i64: 2, 1>, scalar_prefetch = 0 : i64, scratch_operands = 1 : i64, tpu.core_type = #tpu.core_type<tc>, window_params = [{transform_indices = @transform_0, window_bounds = array<i64: 512, 1024>}, {transform_indices = @transform_1, window_bounds = array<i64: 512, 1>}]} {
    %c0_i32 = arith.constant 0 : i32
    %0 = arith.cmpi eq, %arg1, %c0_i32 : i32
    %1 = arith.extui %0 : i1 to i32
    %c0_i32_0 = arith.constant 0 : i32
    %2 = arith.cmpi ne, %1, %c0_i32_0 : i32
    scf.if %2 {
      %cst_9 = arith.constant 0.000000e+00 : f32
      %12 = vector.broadcast %cst_9 : f32 to vector<512x128xf32>
      %c0_10 = arith.constant 0 : index
      %c0_11 = arith.constant 0 : index
      %13 = vector.load %arg4[%c0_10, %c0_11] : memref<512x128xf32, #tpu.memory_space<vmem>>, vector<512x128xf32>
      tpu.vector_store %arg4[%c0_10, %c0_11], %12 {strides = array<i32>} : memref<512x128xf32, #tpu.memory_space<vmem>>, vector<512x128xf32>,
    } else {
    }
    %cst = arith.constant 1.000000e+00 : bf16
    %3 = vector.broadcast %cst : bf16 to vector<1024x128xbf16>
    %c0 = arith.constant 0 : index
    %c0_1 = arith.constant 0 : index
    %4 = vector.load %arg4[%c0, %c0_1] : memref<512x128xf32, #tpu.memory_space<vmem>>, vector<512x128xf32>
    %c0_2 = arith.constant 0 : index
    %c0_3 = arith.constant 0 : index
    %5 = vector.load %arg2[%c0_2, %c0_3] : memref<512x1024xbf16, #tpu.memory_space<vmem>>, vector<512x1024xbf16>
    %cst_4 = arith.constant dense<0.000000e+00> : vector<512x128xf32>
    %6 = tpu.matmul %5, %3, %cst_4 {dimension_numbers = #tpu.dot_dimension_numbers<[1], [0], [0], [1], [0, 0, 1, 1], [], []>} : vector<512x1024xbf16>, vector<1024x128xbf16>, vector<512x128xf32> -> vector<512x128xf32>
    %7 = arith.addf %4, %6 : vector<512x128xf32>
    %c0_5 = arith.constant 0 : index
    %c0_6 = arith.constant 0 : index
    %8 = vector.load %arg4[%c0_5, %c0_6] : memref<512x128xf32, #tpu.memory_space<vmem>>, vector<512x128xf32>
    tpu.vector_store %arg4[%c0_5, %c0_6], %7 {strides = array<i32>} : memref<512x128xf32, #tpu.memory_space<vmem>>, vector<512x128xf32>,
    %c0_i32_7 = arith.constant 0 : i32
    %9 = arith.cmpi eq, %arg1, %c0_i32_7 : i32
    %10 = arith.extui %9 : i1 to i32
    %c0_i32_8 = arith.constant 0 : i32
    %11 = arith.cmpi ne, %10, %c0_i32_8 : i32
    scf.if %11 {
      %c0_9 = arith.constant 0 : index
      %c0_10 = arith.constant 0 : index
      %12 = vector.load %arg4[%c0_9, %c0_10] : memref<512x128xf32, #tpu.memory_space<vmem>>, vector<512x1xf32>
      %13 = math.rsqrt %12 : vector<512x1xf32>
      %c0_11 = arith.constant 0 : index
      %c0_12 = arith.constant 0 : index
      %14 = vector.load %arg3[%c0_11, %c0_12] : memref<512x1xf32, #tpu.memory_space<vmem>>, vector<512x1xf32>
      tpu.vector_store %arg3[%c0_11, %c0_12], %13 {strides = array<i32>} : memref<512x1xf32, #tpu.memory_space<vmem>>, vector<512x1xf32>,
    } else {
    }
    return
  }
  func.func @transform_0(%arg0: i32, %arg1: i32) -> (i32, i32) {
    %c0_i32 = arith.constant 0 : i32
    return %arg0, %arg1 : i32, i32
  }
  func.func @transform_1(%arg0: i32, %arg1: i32) -> (i32, i32) {
    %c0_i32 = arith.constant 0 : i32
    %c0_i32_0 = arith.constant 0 : i32
    return %arg0, %c0_i32 : i32, i32
  }
}

</mosaic_0001>

<bundles_post_ra>
// kernel: tpu_custom_call.1
= control target key start
LH: loop header
LB: loop body
LE: loop exit
PB: predicated region body
PF: predicated region fallthrough
CT: control target
= control target key end

     0   :  { %6 = vsyncpa [#allocation4], 0  ;;  %s4759_s0 = inlined_call_operand.hbm [shape: bf16[1024,1024], index: 0, kind: input, shape index: {}]   ;;  %s4760_s1 = inlined_call_operand.vmem [shape: f32[1024,1], index: 1, kind: output, shape index: {}]  }
   0x1   :  { %8 = vsyncpa [#allocation4 + $0x1], 0  ;;  %s3940_s6 = smov 0   ;;  %s3942_s7 = smov 0  }
   0x2   :  { %s3944_s8 = smov 0   ;;  %s3946_s9 = smov 0  }
   0x3   :  { %s3948_s10 = smov 0   ;;  %s3950_s11 = smov 0  }
   0x4 LB: > { %s3386_s12 = sadd.s32 4294967295, %s3923_s11   ;;  %s26_s13 = sadd.s32 1, %s3919_s10  ;;  %s3923_s11 = sphi %s3950_s11, %s14_s11   ;;  %s3919_s10 = sphi %s3948_s10, %s4812_s10   ;;  %s3915_s9 = sphi %s3946_s9, %s4811_s9   ;;  %s3911_s8 = sphi %s3944_s8, %s4810_s8   ;;  %s3907_s7 = sphi %s3942_s7, %s4809_s7   ;;  %s3903_s6 = sphi %s3940_s6, %s4808_s6  }
   0x5   : > { %p28_p0 = scmp.ge.s32.totalorder %s26_s13, 2  ;;  %s35_s14 = sadd.s32 1, %s3911_s8 }
   0x6   : > { %p42_p1 = scmp.ne.s32.totalorder %s3911_s8, %s3907_s7  ;;  %p43_p2 = scmp.eq.s32.totalorder %s3923_s11, 0 }
   0x7   : > { %s4814_s13 = smov (%p28_p0, %s26_s13), 0  ;;  %p48_p4 = scmp.ne.s32.totalorder %s3907_s7, %s3903_s6 }
   0x8   : > { %p3976_p3 = por %p43_p2, %p42_p1  ;;  %s30_s16 = ssub.s32 %s3919_s10, %s4814_s13 }
   0x9   : > { %p49_p5 = scmp.eq.s32.totalorder %s3386_s12, 0  ;;  %p33_p6 = scmp.eq.s32.totalorder %s30_s16, 0 }
   0xa   : > { %p3664_p8 = scmp.lt.s32.totalorder %s3923_s11, 2  ;;  %s98_s19 = sand.u32 1, %s3911_s8  }
   0xb   : > { %p3983_p7 = por %p49_p5, %p48_p4  ;;  %s3657_s20 = sshll.u32 %s3919_s10, 15 }
   0xc   : > { %s3989_s18 = scalar_select %p33_p6, %s3911_s8, %s35_s14  }
   0xd   : > { %s3390_s21 = sshll.u32 %s98_s19, 11  ;;  %s111_s24 = scalar_lea.hbm %s4759_s0, %s3657_s20 }
   0xe   : > { %s102_s25 = scalar_lea.vmem [#allocation3], %s3390_s21  ;;  %p3998_p9 = pnand %p3664_p8, %p3976_p3 }
   0xf   : > { %s112_s26 = sshll.u32 %s102_s25, 4  ;;  %s99_s28 = scalar_lea.sflag [#allocation4], %s98_s19  ;;  %s113_s26 = int_to_ptr.vmem [resolvable:$true] %s112_s26 }
  0x10   : > { %p3847_p10 = pneg %p3998_p9  ;;  %s3858_s29 = scalar_lea.vmem %s113_s26, 32768 }
  0x11   : > { %p3859_p11 = scmp.ne.s32.totalorder %s113_s26, %s3858_s29  ;;  %s3925_s30 = smov [#allocation3]  }
  0x12   : > { %s3863_s2 = sshll.u32 %s3925_s30, 4  ;;  %s3864_s2 = int_to_ptr.vmem [resolvable:$false] %s3863_s2 }
  0x13   : > { %p3861_p12 = pnand %p3859_p11, %p3847_p10  ;;  %s3865_s3 = scalar_lea.vmem %s3864_s2, 65536 }
  0x14   : > { %p3866_p0 = scmp.lt.s32.totalorder %s113_s26, %s3864_s2  ;;  %p3867_p1 = scmp.lt.s32.totalorder %s3865_s3, %s3858_s29 }
  0x15   : > { %p3862_p13 = pneg %p3861_p12 }
  0x16   : > { %p3868_p2 = por %p3867_p1, %p3866_p0 }
  0x18   : > { %p3869_p3 = pnand %p3868_p2, %p3862_p13 }
  0x1a   : > { %3872 = shalt.err (!%p3869_p3)
}
  0x1b   : > { %s3926_s4 = smov 512   ;;  %s3927_s5 = smov 32  }
  0x1c   : > { %3663 = dma.hbm_to_vmem [thread:$0]  (!%p3998_p9), %s111_s24, 32768, %s113_s26, %s99_s28, %s3926_s4, %s3926_s4, %s3927_s5  }
  0x1d   : > { %p3394_p4 = scmp.ge.s32.totalorder %s3923_s11, 1  ;;  %p120_p5 = scmp.lt.s32.totalorder %s3923_s11, 3 }
  0x1f   : > { %p121_p6 = pnand %p3394_p4, %p120_p5 }
  0x21   : > { %124 = sbr.rel (%p121_p6) target bundleno = 827 (0x33b), region = 24 }
  0x26   : > { %s126_s6 = sand.u32 1, %s3907_s7  }
  0x27   : > { %s3395_s12 = sshll.u32 %s126_s6, 11  ;;  %s127_s14 = scalar_lea.sflag [#allocation4], %s126_s6 }
  0x28   : > { %s4009_s15 = scalar_lea.vmem [#allocation3], %s3395_s12 }
  0x29   : > { %3898 = dma.done.wait (%p3983_p7), %s127_s14, 32768  }
  0x2a   : > { %3900 = vsyncadd (%p3983_p7), %s127_s14, 4294934528  ;;  %v3928_v0 = vmov 0   ;;  %v3929_v1 = vmov 1065369472   ;;  %v4026_v2 = vld [vmem:[%s4009_s15] sm:$0xff]  ;;  %v4032_v4 = vld [vmem:[%s4009_s15 + $0x8] sm:$0xff] }
  0x2b   : > { %1827 = vmatprep.subr.bf16.mxu0 %v3928_v0  ;;  %2116 = vmatprep.subr.bf16.mxu1 %v3928_v0  ;;  %v4029_v3 = vld [vmem:[%s4009_s15 + $0x20] sm:$0xff]  ;;  %v4037_v6 = vld [vmem:[%s4009_s15 + $0x28] sm:$0xff]  ;;  %s3396_s16 = sshll.u32 %s3915_s9, 6  ;;  %vm3242_vm0 = vcmask 7168  }
  0x2c   : > { %1828 = vmatpush1.bf16.msra.mxu0 %v3929_v1  ;;  %2117 = vmatpush1.bf16.msra.mxu1 %v3929_v1  ;;  %v3399_v5 = vcombine.high %v4026_v2, %v4029_v3  ;;  %v3401_v7 = vcombine.high %v4032_v4, %v4037_v6  ;;  %v299_v8 = vld [vmem:[%s4009_s15 + $0x40] sm:$0xff]  ;;  %v300_v10 = vld [vmem:[%s4009_s15 + $0x48] sm:$0xff]  ;;  %v3398_v12 = vcombine.low %v4026_v2, %v4029_v3  ;;  %p152_p7 = scmp.lt.s32.totalorder %s3396_s16, 127 }
  0x2d   : > { %1829 = vmatprep.subr.bf16.mxu0 %v3928_v0  ;;  %2118 = vmatprep.subr.bf16.mxu1 %v3928_v0  ;;  %v303_v9 = vld [vmem:[%s4009_s15 + $0x60] sm:$0xff]  ;;  %v304_v11 = vld [vmem:[%s4009_s15 + $0x68] sm:$0xff]  ;;  %v3400_v13 = vcombine.low %v4032_v4, %v4037_v6 }
  0x2e   : > { %1859 = vmatprep.mubr.bf16.mxu0 %v3399_v5  ;;  %2148 = vmatprep.mubr.bf16.mxu1 %v3401_v7  ;;  %v3407_v14 = vcombine.high %v299_v8, %v303_v9  ;;  %v3409_v15 = vcombine.high %v300_v10, %v304_v11  ;;  %v307_v16 = vld [vmem:[%s4009_s15 + $0x80] sm:$0xff]  ;;  %v308_v18 = vld [vmem:[%s4009_s15 + $0x88] sm:$0xff]  ;;  %v3406_v20 = vcombine.low %v299_v8, %v303_v9  ;;  %s4816_s16 = smov (!%p152_p7, %s3396_s16), 127 }
  0x2f   : > { %v311_v17 = vld [vmem:[%s4009_s15 + $0xa0] sm:$0xff]  ;;  %v312_v19 = vld [vmem:[%s4009_s15 + $0xa8] sm:$0xff]  ;;  %v3408_v21 = vcombine.low %v300_v10, %v304_v11  ;;  %s3397_s9 = sshll.u32 %s4816_s16, 3 }
  0x30   : > { %1830 = vmatpush1.bf16.msra.mxu0 %v3929_v1  ;;  %2119 = vmatpush1.bf16.msra.mxu1 %v3929_v1  ;;  %v3415_v22 = vcombine.high %v307_v16, %v311_v17  ;;  %v3417_v23 = vcombine.high %v308_v18, %v312_v19  ;;  %v315_v24 = vld [vmem:[%s4009_s15 + $0xc0] sm:$0xff]  ;;  %v316_v26 = vld [vmem:[%s4009_s15 + $0xc8] sm:$0xff]  ;;  %v3414_v28 = vcombine.low %v307_v16, %v311_v17  ;;  %s4535_s20 = scalar_lea.vmem %s4760_s1, %s3397_s9 }
  0x31   : > { %1831 = vmatprep.subr.bf16.mxu0 %v3928_v0  ;;  %2120 = vmatprep.subr.bf16.mxu1 %v3928_v0  ;;  %v319_v25 = vld [vmem:[%s4009_s15 + $0xe0] sm:$0xff]  ;;  %v320_v27 = vld [vmem:[%s4009_s15 + $0xe8] sm:$0xff]  ;;  %v3416_v29 = vcombine.low %v308_v18, %v312_v19 }
  0x32   : > { %v3423_v30 = vcombine.high %v315_v24, %v319_v25  ;;  %v3425_v31 = vcombine.high %v316_v26, %v320_v27  ;;  %v323_v32 = vld [vmem:[%s4009_s15 + $0x100] sm:$0xff]  ;;  %v324_v34 = vld [vmem:[%s4009_s15 + $0x108] sm:$0xff]  ;;  %v3422_v36 = vcombine.low %v315_v24, %v319_v25  ;;  %v3424_v37 = vcombine.low %v316_v26, %v320_v27 }
  0x33   : > { %v327_v33 = vld [vmem:[%s4009_s15 + $0x120] sm:$0xff]  ;;  %v328_v35 = vld [vmem:[%s4009_s15 + $0x128] sm:$0xff] }
  0x34   : > { %1832 = vmatpush1.bf16.msra.mxu0 %v3929_v1  ;;  %2121 = vmatpush1.bf16.msra.mxu1 %v3929_v1  ;;  %v3431_v38 = vcombine.high %v323_v32, %v327_v33  ;;  %v3433_v39 = vcombine.high %v324_v34, %v328_v35  ;;  %v331_v40 = vld [vmem:[%s4009_s15 + $0x140] sm:$0xff]  ;;  %v332_v42 = vld [vmem:[%s4009_s15 + $0x148] sm:$0xff]  ;;  %v3430_v44 = vcombine.low %v323_v32, %v327_v33 }
  0x35   : > { %1833 = vmatprep.subr.bf16.mxu0 %v3928_v0  ;;  %2122 = vmatprep.subr.bf16.mxu1 %v3928_v0  ;;  %v335_v41 = vld [vmem:[%s4009_s15 + $0x160] sm:$0xff]  ;;  %v336_v43 = vld [vmem:[%s4009_s15 + $0x168] sm:$0xff]  ;;  %v3432_v45 = vcombine.low %v324_v34, %v328_v35 }
  0x36   : > { %v3439_v46 = vcombine.high %v331_v40, %v335_v41  ;;  %v3441_v47 = vcombine.high %v332_v42, %v336_v43  ;;  %v339_v48 = vld [vmem:[%s4009_s15 + $0x180] sm:$0xff]  ;;  %v340_v50 = vld [vmem:[%s4009_s15 + $0x188] sm:$0xff]  ;;  %v3438_v52 = vcombine.low %v331_v40, %v335_v41  ;;  %v3440_v53 = vcombine.low %v332_v42, %v336_v43 }
  0x37   : > { %v343_v49 = vld [vmem:[%s4009_s15 + $0x1a0] sm:$0xff]  ;;  %v344_v51 = vld [vmem:[%s4009_s15 + $0x1a8] sm:$0xff] }
  0x38   : > { %1834 = vmatpush1.bf16.msra.mxu0 %v3929_v1  ;;  %2123 = vmatpush1.bf16.msra.mxu1 %v3929_v1  ;;  %v3447_v54 = vcombine.high %v339_v48, %v343_v49  ;;  %v3449_v55 = vcombine.high %v340_v50, %v344_v51  ;;  %v347_v56 = vld [vmem:[%s4009_s15 + $0x1c0] sm:$0xff]  ;;  %v348_v58 = vld [vmem:[%s4009_s15 + $0x1c8] sm:$0xff]  ;;  %v3446_v60 = vcombine.low %v339_v48, %v343_v49 }
  0x39   : > { %1835 = vmatprep.subr.bf16.mxu0 %v3928_v0  ;;  %2124 = vmatprep.subr.bf16.mxu1 %v3928_v0  ;;  %v351_v57 = vld [vmem:[%s4009_s15 + $0x1e0] sm:$0xff]  ;;  %v352_v59 = vld [vmem:[%s4009_s15 + $0x1e8] sm:$0xff]  ;;  %v3448_v61 = vcombine.low %v340_v50, %v344_v51 }
  0x3a   : > { %v3455_v62 = vcombine.high %v347_v56, %v351_v57  ;;  %v3457_v63 = vcombine.high %v348_v58, %v352_v59  ;;  %v355_v2 = vld [vmem:[%s4009_s15 + $0x200] sm:$0xff]  ;;  %v356_v4 = vld [vmem:[%s4009_s15 + $0x208] sm:$0xff]  ;;  %v3454_v6 = vcombine.low %v347_v56, %v351_v57  ;;  %v3456_v7 = vcombine.low %v348_v58, %v352_v59 }
  0x3b   : > { %v359_v3 = vld [vmem:[%s4009_s15 + $0x220] sm:$0xff]  ;;  %v360_v5 = vld [vmem:[%s4009_s15 + $0x228] sm:$0xff] }
  0x3c   : > { %1836 = vmatpush1.bf16.msra.mxu0 %v3929_v1  ;;  %2125 = vmatpush1.bf16.msra.mxu1 %v3929_v1  ;;  %v3463_v8 = vcombine.high %v355_v2, %v359_v3  ;;  %v3465_v9 = vcombine.high %v356_v4, %v360_v5  ;;  %v363_v10 = vld [vmem:[%s4009_s15 + $0x240] sm:$0xff]  ;;  %v380_v26 = vld [vmem:[%s4009_s15 + $0x2c8] sm:$0xff] }
  0x3d   : > { %1837 = vmatprep.subr.bf16.mxu0 %v3928_v0  ;;  %2126 = vmatprep.subr.bf16.mxu1 %v3928_v0  ;;  %v367_v11 = vld [vmem:[%s4009_s15 + $0x260] sm:$0xff]  ;;  %v384_v27 = vld [vmem:[%s4009_s15 + $0x2e8] sm:$0xff] }
  0x3e   : > { %v3471_v16 = vcombine.high %v363_v10, %v367_v11  ;;  %v371_v18 = vld [vmem:[%s4009_s15 + $0x280] sm:$0xff]  ;;  %v388_v34 = vld [vmem:[%s4009_s15 + $0x308] sm:$0xff] }
  0x3f   : > { %v375_v19 = vld [vmem:[%s4009_s15 + $0x2a0] sm:$0xff]  ;;  %v392_v35 = vld [vmem:[%s4009_s15 + $0x328] sm:$0xff] }
  0x40   : > { %1838 = vmatpush1.bf16.msra.mxu0 %v3929_v1  ;;  %2127 = vmatpush1.bf16.msra.mxu1 %v3929_v1  ;;  %v383_v25 = vld [vmem:[%s4009_s15 + $0x2e0] sm:$0xff]  ;;  %v396_v42 = vld [vmem:[%s4009_s15 + $0x348] sm:$0xff] }
  0x41   : > { %1839 = vmatprep.subr.bf16.mxu0 %v3928_v0  ;;  %2128 = vmatprep.subr.bf16.mxu1 %v3928_v0  ;;  %v387_v32 = vld [vmem:[%s4009_s15 + $0x300] sm:$0xff]  ;;  %v400_v43 = vld [vmem:[%s4009_s15 + $0x368] sm:$0xff] }
  0x42   : > { %v391_v33 = vld [vmem:[%s4009_s15 + $0x320] sm:$0xff]  ;;  %v404_v50 = vld [vmem:[%s4009_s15 + $0x388] sm:$0xff] }
  0x43   : > { %v395_v40 = vld [vmem:[%s4009_s15 + $0x340] sm:$0xff]  ;;  %v408_v51 = vld [vmem:[%s4009_s15 + $0x3a8] sm:$0xff] }
  0x44   : > { %1840 = vmatpush1.bf16.msra.mxu0 %v3929_v1  ;;  %2129 = vmatpush1.bf16.msra.mxu1 %v3929_v1  ;;  %v399_v41 = vld [vmem:[%s4009_s15 + $0x360] sm:$0xff]  ;;  %v412_v58 = vld [vmem:[%s4009_s15 + $0x3c8] sm:$0xff] }
  0x45   : > { %1841 = vmatprep.subr.bf16.mxu0 %v3928_v0  ;;  %2130 = vmatprep.subr.bf16.mxu1 %v3928_v0  ;;  %v403_v48 = vld [vmem:[%s4009_s15 + $0x380] sm:$0xff]  ;;  %v416_v59 = vld [vmem:[%s4009_s15 + $0x3e8] sm:$0xff] }
  0x46   : > { %v407_v49 = vld [vmem:[%s4009_s15 + $0x3a0] sm:$0xff] }
  0x47   : > { %v411_v56 = vld [vmem:[%s4009_s15 + $0x3c0] sm:$0xff] }
  0x48   : > { %1842 = vmatpush1.bf16.msra.mxu0 %v3929_v1  ;;  %2131 = vmatpush1.bf16.msra.mxu1 %v3929_v1  ;;  %v415_v57 = vld [vmem:[%s4009_s15 + $0x3e0] sm:$0xff] }
  0x49   : > { %1843 = vmatprep.subr.bf16.mxu0 %v3928_v0  ;;  %2132 = vmatprep.subr.bf16.mxu1 %v3928_v0 }
  0x4c   : > { %1844 = vmatpush2.bf16.msra.mxu0 %v3929_v1  ;;  %2133 = vmatpush2.bf16.msra.mxu1 %v3929_v1 }
  0x4d   : > { %1845 = vmatprep.subr.bf16.mxu0 %v3928_v0  ;;  %2134 = vmatprep.subr.bf16.mxu1 %v3928_v0 }
  0x50   : > { %1846 = vmatpush2.bf16.msra.mxu0 %v3929_v1  ;;  %2135 = vmatpush2.bf16.msra.mxu1 %v3929_v1 }
  0x51   : > { %1847 = vmatprep.subr.bf16.mxu0 %v3928_v0  ;;  %2136 = vmatprep.subr.bf16.mxu1 %v3928_v0 }
  0x54   : > { %1848 = vmatpush2.bf16.msra.mxu0 %v3929_v1  ;;  %2137 = vmatpush2.bf16.msra.mxu1 %v3929_v1 }
  0x55   : > { %1849 = vmatprep.subr.bf16.mxu0 %v3928_v0  ;;  %2138 = vmatprep.subr.bf16.mxu1 %v3928_v0 }
  0x58   : > { %1850 = vmatpush2.bf16.msra.mxu0 %v3929_v1  ;;  %2139 = vmatpush2.bf16.msra.mxu1 %v3929_v1 }
  0x59   : > { %1851 = vmatprep.subr.bf16.mxu0 %v3928_v0  ;;  %2140 = vmatprep.subr.bf16.mxu1 %v3928_v0 }
  0x5c   : > { %1852 = vmatpush2.bf16.msra.mxu0 %v3929_v1  ;;  %2141 = vmatpush2.bf16.msra.mxu1 %v3929_v1 }
  0x5d   : > { %1853 = vmatprep.subr.bf16.mxu0 %v3928_v0  ;;  %2142 = vmatprep.subr.bf16.mxu1 %v3928_v0 }
  0x60   : > { %1854 = vmatpush2.bf16.msra.mxu0 %v3929_v1  ;;  %2143 = vmatpush2.bf16.msra.mxu1 %v3929_v1 }
  0x61   : > { %1855 = vmatprep.subr.bf16.mxu0 %v3928_v0  ;;  %2144 = vmatprep.subr.bf16.mxu1 %v3928_v0 }
  0x64   : > { %1856 = vmatpush2.bf16.msra.mxu0 %v3929_v1  ;;  %2145 = vmatpush2.bf16.msra.mxu1 %v3929_v1 }
  0x65   : > { %1857 = vmatprep.subr.bf16.mxu0 %v3928_v0  ;;  %2146 = vmatprep.subr.bf16.mxu1 %v3928_v0 }
  0x68   : > { %1858 = vmatpush2.bf16.msra.mxu0 %v3929_v1  ;;  %2147 = vmatpush2.bf16.msra.mxu1 %v3929_v1 }
  0x69   : > { %2405 = vmatprep.subr.bf16.mxu0 %v3928_v0  ;;  %2694 = vmatprep.subr.bf16.mxu1 %v3928_v0 }
  0x6b   : > { %1860 = vmatmul.mubr.bf16.vlgmr.msra.gmra.mxu0 %v3398_v12  ;;  %2149 = vmatmul.mubr.bf16.vlgmr.msra.gmra.mxu1 %v3400_v13  ;;  %v364_v12 = vld [vmem:[%s4009_s15 + $0x248] sm:$0xff] }
  0x6c   : > { %2406 = vmatpush1.bf16.msra.mxu0 %v3929_v1  ;;  %2695 = vmatpush1.bf16.msra.mxu1 %v3929_v1  ;;  %v368_v13 = vld [vmem:[%s4009_s15 + $0x268] sm:$0xff] }
  0x6d   : > { %1867 = vmatprep.mubr.bf16.mxu0 %v3407_v14  ;;  %2156 = vmatprep.mubr.bf16.mxu1 %v3409_v15  ;;  %v3462_v14 = vcombine.low %v355_v2, %v359_v3  ;;  %v3464_v15 = vcombine.low %v356_v4, %v360_v5  ;;  %v3473_v17 = vcombine.high %v364_v12, %v368_v13  ;;  %v419_v2 = vld [vmem:[%s4009_s15 + $0x400] sm:$0xff]  ;;  %v420_v4 = vld [vmem:[%s4009_s15 + $0x408] sm:$0xff] }
  0x6e   : > { %2407 = vmatprep.subr.bf16.mxu0 %v3928_v0  ;;  %2696 = vmatprep.subr.bf16.mxu1 %v3928_v0  ;;  %v423_v3 = vld [vmem:[%s4009_s15 + $0x420] sm:$0xff]  ;;  %v424_v5 = vld [vmem:[%s4009_s15 + $0x428] sm:$0xff] }
  0x70   : > { %2408 = vmatpush1.bf16.msra.mxu0 %v3929_v1  ;;  %2697 = vmatpush1.bf16.msra.mxu1 %v3929_v1 }
  0x71   : > { %2409 = vmatprep.subr.bf16.mxu0 %v3928_v0  ;;  %2698 = vmatprep.subr.bf16.mxu1 %v3928_v0 }
  0x73   : > { %1868 = vmatmul.mubr.bf16.gmra.mxu0 %v3406_v20  ;;  %2157 = vmatmul.mubr.bf16.gmra.mxu1 %v3408_v21  ;;  %v372_v20 = vld [vmem:[%s4009_s15 + $0x288] sm:$0xff]  ;;  %v3470_v21 = vcombine.low %v363_v10, %v367_v11  ;;  %v427_v10 = vld [vmem:[%s4009_s15 + $0x440] sm:$0xff] }
  0x74   : > { %1875 = vmatprep.mubr.bf16.mxu0 %v3415_v22  ;;  %2164 = vmatprep.mubr.bf16.mxu1 %v3417_v23  ;;  %v3472_v22 = vcombine.low %v364_v12, %v368_v13  ;;  %v3479_v23 = vcombine.high %v371_v18, %v375_v19  ;;  %v431_v11 = vld [vmem:[%s4009_s15 + $0x460] sm:$0xff]  ;;  %v428_v12 = vld [vmem:[%s4009_s15 + $0x448] sm:$0xff] }
  0x75   : > { %2410 = vmatpush1.bf16.msra.mxu0 %v3929_v1  ;;  %2699 = vmatpush1.bf16.msra.mxu1 %v3929_v1  ;;  %v432_v13 = vld [vmem:[%s4009_s15 + $0x468] sm:$0xff] }
  0x76   : > { %2411 = vmatprep.subr.bf16.mxu0 %v3928_v0  ;;  %2700 = vmatprep.subr.bf16.mxu1 %v3928_v0 }
  0x79   : > { %2412 = vmatpush1.bf16.msra.mxu0 %v3929_v1  ;;  %2701 = vmatpush1.bf16.msra.mxu1 %v3929_v1 }
  0x7a   : > { %2413 = vmatprep.subr.bf16.mxu0 %v3928_v0  ;;  %2702 = vmatprep.subr.bf16.mxu1 %v3928_v0 }
  0x7b   : > { %1876 = vmatmul.mubr.bf16.gmra.mxu0 %v3414_v28  ;;  %2165 = vmatmul.mubr.bf16.gmra.mxu1 %v3416_v29  ;;  %v3478_v28 = vcombine.low %v371_v18, %v375_v19  ;;  %v435_v18 = vld [vmem:[%s4009_s15 + $0x480] sm:$0xff] }
  0x7c   : > { %1883 = vmatprep.mubr.bf16.mxu0 %v3423_v30  ;;  %2172 = vmatprep.mubr.bf16.mxu1 %v3425_v31  ;;  %v3489_v31 = vcombine.high %v380_v26, %v384_v27  ;;  %v439_v19 = vld [vmem:[%s4009_s15 + $0x4a0] sm:$0xff] }
  0x7d   : > { %2414 = vmatpush1.bf16.msra.mxu0 %v3929_v1  ;;  %2703 = vmatpush1.bf16.msra.mxu1 %v3929_v1 }
  0x7e   : > { %2415 = vmatprep.subr.bf16.mxu0 %v3928_v0  ;;  %2704 = vmatprep.subr.bf16.mxu1 %v3928_v0 }
  0x81   : > { %2416 = vmatpush1.bf16.msra.mxu0 %v3929_v1  ;;  %2705 = vmatpush1.bf16.msra.mxu1 %v3929_v1 }
  0x82   : > { %2417 = vmatprep.subr.bf16.mxu0 %v3928_v0  ;;  %2706 = vmatprep.subr.bf16.mxu1 %v3928_v0 }
  0x83   : > { %1884 = vmatmul.mubr.bf16.gmra.mxu0 %v3422_v36  ;;  %2173 = vmatmul.mubr.bf16.gmra.mxu1 %v3424_v37  ;;  %v3488_v37 = vcombine.low %v380_v26, %v384_v27  ;;  %v444_v26 = vld [vmem:[%s4009_s15 + $0x4c8] sm:$0xff] }
  0x84   : > { %1891 = vmatprep.mubr.bf16.mxu0 %v3431_v38  ;;  %2180 = vmatprep.mubr.bf16.mxu1 %v3433_v39  ;;  %v3495_v38 = vcombine.high %v387_v32, %v391_v33  ;;  %v3497_v39 = vcombine.high %v388_v34, %v392_v35  ;;  %v448_v27 = vld [vmem:[%s4009_s15 + $0x4e8] sm:$0xff] }
  0x85   : > { %2418 = vmatpush1.bf16.msra.mxu0 %v3929_v1  ;;  %2707 = vmatpush1.bf16.msra.mxu1 %v3929_v1 }
  0x86   : > { %2419 = vmatprep.subr.bf16.mxu0 %v3928_v0  ;;  %2708 = vmatprep.subr.bf16.mxu1 %v3928_v0 }
  0x89   : > { %2420 = vmatpush1.bf16.msra.mxu0 %v3929_v1  ;;  %2709 = vmatpush1.bf16.msra.mxu1 %v3929_v1 }
  0x8a   : > { %2421 = vmatprep.subr.bf16.mxu0 %v3928_v0  ;;  %2710 = vmatprep.subr.bf16.mxu1 %v3928_v0 }
  0x8b   : > { %1892 = vmatmul.mubr.bf16.gmra.mxu0 %v3430_v44  ;;  %2181 = vmatmul.mubr.bf16.gmra.mxu1 %v3432_v45  ;;  %v3494_v44 = vcombine.low %v387_v32, %v391_v33  ;;  %v3496_v45 = vcombine.low %v388_v34, %v392_v35  ;;  %v451_v32 = vld [vmem:[%s4009_s15 + $0x500] sm:$0xff]  ;;  %v452_v34 = vld [vmem:[%s4009_s15 + $0x508] sm:$0xff] }
  0x8c   : > { %1899 = vmatprep.mubr.bf16.mxu0 %v3439_v46  ;;  %2188 = vmatprep.mubr.bf16.mxu1 %v3441_v47  ;;  %v3503_v46 = vcombine.high %v395_v40, %v399_v41  ;;  %v3505_v47 = vcombine.high %v396_v42, %v400_v43  ;;  %v455_v33 = vld [vmem:[%s4009_s15 + $0x520] sm:$0xff]  ;;  %v456_v35 = vld [vmem:[%s4009_s15 + $0x528] sm:$0xff] }
  0x8d   : > { %2422 = vmatpush2.bf16.msra.mxu0 %v3929_v1  ;;  %2711 = vmatpush2.bf16.msra.mxu1 %v3929_v1 }
  0x8e   : > { %2423 = vmatprep.subr.bf16.mxu0 %v3928_v0  ;;  %2712 = vmatprep.subr.bf16.mxu1 %v3928_v0 }
  0x91   : > { %2424 = vmatpush2.bf16.msra.mxu0 %v3929_v1  ;;  %2713 = vmatpush2.bf16.msra.mxu1 %v3929_v1 }
  0x92   : > { %2425 = vmatprep.subr.bf16.mxu0 %v3928_v0  ;;  %2714 = vmatprep.subr.bf16.mxu1 %v3928_v0 }
  0x93   : > { %1900 = vmatmul.mubr.bf16.gmra.mxu0 %v3438_v52  ;;  %2189 = vmatmul.mubr.bf16.gmra.mxu1 %v3440_v53  ;;  %v3502_v52 = vcombine.low %v395_v40, %v399_v41  ;;  %v3504_v53 = vcombine.low %v396_v42, %v400_v43  ;;  %v459_v40 = vld [vmem:[%s4009_s15 + $0x540] sm:$0xff]  ;;  %v460_v42 = vld [vmem:[%s4009_s15 + $0x548] sm:$0xff] }
  0x94   : > { %1907 = vmatprep.mubr.bf16.mxu0 %v3447_v54  ;;  %2196 = vmatprep.mubr.bf16.mxu1 %v3449_v55  ;;  %v3511_v54 = vcombine.high %v403_v48, %v407_v49  ;;  %v3513_v55 = vcombine.high %v404_v50, %v408_v51  ;;  %v463_v41 = vld [vmem:[%s4009_s15 + $0x560] sm:$0xff]  ;;  %v464_v43 = vld [vmem:[%s4009_s15 + $0x568] sm:$0xff] }
  0x95   : > { %2426 = vmatpush2.bf16.msra.mxu0 %v3929_v1  ;;  %2715 = vmatpush2.bf16.msra.mxu1 %v3929_v1 }
  0x96   : > { %2427 = vmatprep.subr.bf16.mxu0 %v3928_v0  ;;  %2716 = vmatprep.subr.bf16.mxu1 %v3928_v0 }
  0x99   : > { %2428 = vmatpush2.bf16.msra.mxu0 %v3929_v1  ;;  %2717 = vmatpush2.bf16.msra.mxu1 %v3929_v1 }
  0x9a   : > { %2429 = vmatprep.subr.bf16.mxu0 %v3928_v0  ;;  %2718 = vmatprep.subr.bf16.mxu1 %v3928_v0 }
  0x9b   : > { %1908 = vmatmul.mubr.bf16.gmra.mxu0 %v3446_v60  ;;  %2197 = vmatmul.mubr.bf16.gmra.mxu1 %v3448_v61  ;;  %v3510_v60 = vcombine.low %v403_v48, %v407_v49  ;;  %v3512_v61 = vcombine.low %v404_v50, %v408_v51  ;;  %v467_v48 = vld [vmem:[%s4009_s15 + $0x580] sm:$0xff]  ;;  %v468_v50 = vld [vmem:[%s4009_s15 + $0x588] sm:$0xff] }
  0x9c   : > { %1915 = vmatprep.mubr.bf16.mxu0 %v3455_v62  ;;  %2204 = vmatprep.mubr.bf16.mxu1 %v3457_v63  ;;  %v3519_v62 = vcombine.high %v411_v56, %v415_v57  ;;  %v3521_v63 = vcombine.high %v412_v58, %v416_v59  ;;  %v471_v49 = vld [vmem:[%s4009_s15 + $0x5a0] sm:$0xff]  ;;  %v472_v51 = vld [vmem:[%s4009_s15 + $0x5a8] sm:$0xff] }
  0x9d   : > { %2430 = vmatpush2.bf16.msra.mxu0 %v3929_v1  ;;  %2719 = vmatpush2.bf16.msra.mxu1 %v3929_v1 }
  0x9e   : > { %2431 = vmatprep.subr.bf16.mxu0 %v3928_v0  ;;  %2720 = vmatprep.subr.bf16.mxu1 %v3928_v0 }
  0xa1   : > { %2432 = vmatpush2.bf16.msra.mxu0 %v3929_v1  ;;  %2721 = vmatpush2.bf16.msra.mxu1 %v3929_v1 }
  0xa2   : > { %2433 = vmatprep.subr.bf16.mxu0 %v3928_v0  ;;  %2722 = vmatprep.subr.bf16.mxu1 %v3928_v0 }
  0xa3   : > { %1916 = vmatmul.mubr.bf16.gmra.mxu0 %v3454_v6  ;;  %2205 = vmatmul.mubr.bf16.gmra.mxu1 %v3456_v7  ;;  %v3518_v6 = vcombine.low %v411_v56, %v415_v57  ;;  %v3520_v7 = vcombine.low %v412_v58, %v416_v59  ;;  %v475_v56 = vld [vmem:[%s4009_s15 + $0x5c0] sm:$0xff]  ;;  %v476_v58 = vld [vmem:[%s4009_s15 + $0x5c8] sm:$0xff] }
  0xa4   : > { %1923 = vmatprep.mubr.bf16.mxu0 %v3463_v8  ;;  %2212 = vmatprep.mubr.bf16.mxu1 %v3465_v9  ;;  %v3527_v8 = vcombine.high %v419_v2, %v423_v3  ;;  %v3529_v9 = vcombine.high %v420_v4, %v424_v5  ;;  %v479_v57 = vld [vmem:[%s4009_s15 + $0x5e0] sm:$0xff]  ;;  %v480_v59 = vld [vmem:[%s4009_s15 + $0x5e8] sm:$0xff] }
  0xa5   : > { %2434 = vmatpush2.bf16.msra.mxu0 %v3929_v1  ;;  %2723 = vmatpush2.bf16.msra.mxu1 %v3929_v1 }
  0xa6   : > { %2435 = vmatprep.subr.bf16.mxu0 %v3928_v0  ;;  %2724 = vmatprep.subr.bf16.mxu1 %v3928_v0  ;;  %v376_v0 = vld [vmem:[%s4009_s15 + $0x2a8] sm:$0xff] }
  0xa7   : > { %v3481_v24 = vcombine.high %v372_v20, %v376_v0  ;;  %v3480_v29 = vcombine.low %v372_v20, %v376_v0  ;;  %v436_v20 = vld [vmem:[%s4009_s15 + $0x488] sm:$0xff] }
  0xa8   : > { %v440_v0 = vld [vmem:[%s4009_s15 + $0x4a8] sm:$0xff] }
  0xa9   : > { %2436 = vmatpush2.bf16.msra.mxu0 %v3929_v1  ;;  %2725 = vmatpush2.bf16.msra.mxu1 %v3929_v1  ;;  %v379_v1 = vld [vmem:[%s4009_s15 + $0x2c0] sm:$0xff] }
  0xaa   : > { %v3487_v30 = vcombine.high %v379_v1, %v383_v25  ;;  %v3486_v36 = vcombine.low %v379_v1, %v383_v25  ;;  %v443_v1 = vld [vmem:[%s4009_s15 + $0x4c0] sm:$0xff] }
  0xab   : > { %1924 = vmatmul.mubr.bf16.gmra.mxu0 %v3462_v14  ;;  %2213 = vmatmul.mubr.bf16.gmra.mxu1 %v3464_v15  ;;  %v3526_v14 = vcombine.low %v419_v2, %v423_v3  ;;  %v3528_v15 = vcombine.low %v420_v4, %v424_v5  ;;  %v447_v25 = vld [vmem:[%s4009_s15 + $0x4e0] sm:$0xff]  ;;  %v484_v4 = vld [vmem:[%s4009_s15 + $0x608] sm:$0xff] }
  0xac   : > { %1931 = vmatprep.mubr.bf16.mxu0 %v3471_v16  ;;  %2220 = vmatprep.mubr.bf16.mxu1 %v3473_v17  ;;  %v3535_v16 = vcombine.high %v427_v10, %v431_v11  ;;  %v3537_v17 = vcombine.high %v428_v12, %v432_v13  ;;  %v483_v2 = vld [vmem:[%s4009_s15 + $0x600] sm:$0xff]  ;;  %v488_v5 = vld [vmem:[%s4009_s15 + $0x628] sm:$0xff] }
  0xad   : > { %v487_v3 = vld [vmem:[%s4009_s15 + $0x620] sm:$0xff] }
  0xb3   : > { %1932 = vmatmul.mubr.bf16.gmra.mxu0 %v3470_v21  ;;  %2221 = vmatmul.mubr.bf16.gmra.mxu1 %v3472_v22  ;;  %v3534_v21 = vcombine.low %v427_v10, %v431_v11  ;;  %v3536_v22 = vcombine.low %v428_v12, %v432_v13  ;;  %v491_v10 = vld [vmem:[%s4009_s15 + $0x640] sm:$0xff]  ;;  %v492_v12 = vld [vmem:[%s4009_s15 + $0x648] sm:$0xff] }
  0xb4   : > { %1939 = vmatprep.mubr.bf16.mxu0 %v3479_v23  ;;  %2228 = vmatprep.mubr.bf16.mxu1 %v3481_v24  ;;  %v3543_v23 = vcombine.high %v435_v18, %v439_v19  ;;  %v3545_v24 = vcombine.high %v436_v20, %v440_v0  ;;  %v495_v11 = vld [vmem:[%s4009_s15 + $0x660] sm:$0xff]  ;;  %v496_v13 = vld [vmem:[%s4009_s15 + $0x668] sm:$0xff] }
  0xbb   : > { %1940 = vmatmul.mubr.bf16.gmra.mxu0 %v3478_v28  ;;  %2229 = vmatmul.mubr.bf16.gmra.mxu1 %v3480_v29  ;;  %v3542_v28 = vcombine.low %v435_v18, %v439_v19  ;;  %v3544_v29 = vcombine.low %v436_v20, %v440_v0  ;;  %v499_v0 = vld [vmem:[%s4009_s15 + $0x680] sm:$0xff] }
  0xbc   : > { %1947 = vmatprep.mubr.bf16.mxu0 %v3487_v30  ;;  %2236 = vmatprep.mubr.bf16.mxu1 %v3489_v31  ;;  %v3551_v30 = vcombine.high %v443_v1, %v447_v25  ;;  %v3553_v31 = vcombine.high %v444_v26, %v448_v27 }
  0xc3   : > { %1948 = vmatmul.mubr.bf16.gmra.mxu0 %v3486_v36  ;;  %2237 = vmatmul.mubr.bf16.gmra.mxu1 %v3488_v37  ;;  %v3550_v36 = vcombine.low %v443_v1, %v447_v25  ;;  %v3552_v37 = vcombine.low %v444_v26, %v448_v27  ;;  %v504_v1 = vld [vmem:[%s4009_s15 + $0x6a8] sm:$0xff]  ;;  %v3598_v27 = vcombine.low %v491_v10, %v495_v11 }
  0xc4   : > { %1955 = vmatprep.mubr.bf16.mxu0 %v3495_v38  ;;  %2244 = vmatprep.mubr.bf16.mxu1 %v3497_v39  ;;  %v3559_v38 = vcombine.high %v451_v32, %v455_v33  ;;  %v3561_v39 = vcombine.high %v452_v34, %v456_v35 }
  0xcb   : > { %1956 = vmatmul.mubr.bf16.gmra.mxu0 %v3494_v44  ;;  %2245 = vmatmul.mubr.bf16.gmra.mxu1 %v3496_v45  ;;  %v3558_v44 = vcombine.low %v451_v32, %v455_v33  ;;  %v3560_v45 = vcombine.low %v452_v34, %v456_v35 }
  0xcc   : > { %1963 = vmatprep.mubr.bf16.mxu0 %v3503_v46  ;;  %2252 = vmatprep.mubr.bf16.mxu1 %v3505_v47  ;;  %v3567_v46 = vcombine.high %v459_v40, %v463_v41  ;;  %v3569_v47 = vcombine.high %v460_v42, %v464_v43 }
  0xd3   : > { %1964 = vmatmul.mubr.bf16.gmra.mxu0 %v3502_v52  ;;  %2253 = vmatmul.mubr.bf16.gmra.mxu1 %v3504_v53  ;;  %v3566_v52 = vcombine.low %v459_v40, %v463_v41  ;;  %v3568_v53 = vcombine.low %v460_v42, %v464_v43  ;;  %v511_v40 = vld [vmem:[%s4009_s15 + $0x6e0] sm:$0xff]  ;;  %v508_v41 = vld [vmem:[%s4009_s15 + $0x6c8] sm:$0xff] }
  0xd4   : > { %1971 = vmatprep.mubr.bf16.mxu0 %v3511_v54  ;;  %2260 = vmatprep.mubr.bf16.mxu1 %v3513_v55  ;;  %v3575_v54 = vcombine.high %v467_v48, %v471_v49  ;;  %v3577_v55 = vcombine.high %v468_v50, %v472_v51  ;;  %v512_v42 = vld [vmem:[%s4009_s15 + $0x6e8] sm:$0xff] }
  0xdb   : > { %1972 = vmatmul.mubr.bf16.gmra.mxu0 %v3510_v60  ;;  %2261 = vmatmul.mubr.bf16.gmra.mxu1 %v3512_v61  ;;  %v3574_v60 = vcombine.low %v467_v48, %v471_v49  ;;  %v3576_v61 = vcombine.low %v468_v50, %v472_v51  ;;  %v3617_v49 = vcombine.high %v508_v41, %v512_v42 }
  0xdc   : > { %1979 = vmatprep.mubr.bf16.mxu0 %v3519_v62  ;;  %2268 = vmatprep.mubr.bf16.mxu1 %v3521_v63  ;;  %v3583_v62 = vcombine.high %v475_v56, %v479_v57  ;;  %v3585_v63 = vcombine.high %v476_v58, %v480_v59 }
  0xe3   : > { %1980 = vmatmul.mubr.bf16.gmra.mxu0 %v3518_v6  ;;  %2269 = vmatmul.mubr.bf16.gmra.mxu1 %v3520_v7  ;;  %v3582_v6 = vcombine.low %v475_v56, %v479_v57  ;;  %v3584_v7 = vcombine.low %v476_v58, %v480_v59  ;;  %v519_v58 = vld [vmem:[%s4009_s15 + $0x720] sm:$0xff]  ;;  %v516_v59 = vld [vmem:[%s4009_s15 + $0x708] sm:$0xff] }
  0xe4   : > { %1987 = vmatprep.mubr.bf16.mxu0 %v3527_v8  ;;  %2276 = vmatprep.mubr.bf16.mxu1 %v3529_v9  ;;  %v3591_v8 = vcombine.high %v483_v2, %v487_v3  ;;  %v3593_v9 = vcombine.high %v484_v4, %v488_v5 }
  0xeb   : > { %1988 = vmatmul.mubr.bf16.gmra.mxu0 %v3526_v14  ;;  %2277 = vmatmul.mubr.bf16.gmra.mxu1 %v3528_v15  ;;  %v3590_v14 = vcombine.low %v483_v2, %v487_v3  ;;  %v3592_v15 = vcombine.low %v484_v4, %v488_v5  ;;  %v3616_v2 = vcombine.low %v508_v41, %v512_v42 }
  0xec   : > { %1995 = vmatprep.mubr.bf16.mxu0 %v3535_v16  ;;  %2284 = vmatprep.mubr.bf16.mxu1 %v3537_v17  ;;  %v3599_v16 = vcombine.high %v491_v10, %v495_v11  ;;  %v3601_v17 = vcombine.high %v492_v12, %v496_v13  ;;  %v523_v11 = vld [vmem:[%s4009_s15 + $0x740] sm:$0xff] }
  0xf3   : > { %1996 = vmatmul.mubr.bf16.gmra.mxu0 %v3534_v21  ;;  %2285 = vmatmul.mubr.bf16.gmra.mxu1 %v3536_v22 }
  0xf4   : > { %2003 = vmatprep.mubr.bf16.mxu0 %v3543_v23  ;;  %2292 = vmatprep.mubr.bf16.mxu1 %v3545_v24  ;;  %v503_v23 = vld [vmem:[%s4009_s15 + $0x6a0] sm:$0xff]  ;;  %v500_v24 = vld [vmem:[%s4009_s15 + $0x688] sm:$0xff] }
  0xfb   : > { %2004 = vmatmul.mubr.bf16.gmra.mxu0 %v3542_v28  ;;  %2293 = vmatmul.mubr.bf16.gmra.mxu1 %v3544_v29  ;;  %v3600_v28 = vcombine.low %v492_v12, %v496_v13 }
  0xfc   : > { %2011 = vmatprep.mubr.bf16.mxu0 %v3551_v30  ;;  %2300 = vmatprep.mubr.bf16.mxu1 %v3553_v31  ;;  %v3607_v30 = vcombine.high %v499_v0, %v503_v23  ;;  %v3609_v31 = vcombine.high %v500_v24, %v504_v1 }
 0x103   : > { %2012 = vmatmul.mubr.bf16.gmra.mxu0 %v3550_v36  ;;  %2301 = vmatmul.mubr.bf16.gmra.mxu1 %v3552_v37  ;;  %v507_v37 = vld [vmem:[%s4009_s15 + $0x6c0] sm:$0xff] }
 0x104   : > { %2019 = vmatprep.mubr.bf16.mxu0 %v3559_v38  ;;  %2308 = vmatprep.mubr.bf16.mxu1 %v3561_v39  ;;  %v3615_v48 = vcombine.high %v507_v37, %v511_v40 }
 0x10b   : > { %2020 = vmatmul.mubr.bf16.gmra.mxu0 %v3558_v44  ;;  %2309 = vmatmul.mubr.bf16.gmra.mxu1 %v3560_v45  ;;  %v3606_v45 = vcombine.low %v499_v0, %v503_v23 }
 0x10c   : > { %2027 = vmatprep.mubr.bf16.mxu0 %v3567_v46  ;;  %2316 = vmatprep.mubr.bf16.mxu1 %v3569_v47  ;;  %v3608_v46 = vcombine.low %v500_v24, %v504_v1 }
 0x113   : > { %2028 = vmatmul.mubr.bf16.gmra.mxu0 %v3566_v52  ;;  %2317 = vmatmul.mubr.bf16.gmra.mxu1 %v3568_v53 }
 0x114   : > { %2035 = vmatprep.mubr.bf16.mxu0 %v3575_v54  ;;  %2324 = vmatprep.mubr.bf16.mxu1 %v3577_v55  ;;  %v515_v55 = vld [vmem:[%s4009_s15 + $0x700] sm:$0xff] }
 0x115   : > { %v3623_v4 = vcombine.high %v515_v55, %v519_v58 }
 0x11b   : > { %2036 = vmatmul.mubr.bf16.gmra.mxu0 %v3574_v60  ;;  %2325 = vmatmul.mubr.bf16.gmra.mxu1 %v3576_v61  ;;  %v520_v60 = vld [vmem:[%s4009_s15 + $0x728] sm:$0xff] }
 0x11c   : > { %2043 = vmatprep.mubr.bf16.mxu0 %v3583_v62  ;;  %2332 = vmatprep.mubr.bf16.mxu1 %v3585_v63  ;;  %v3614_v63 = vcombine.low %v507_v37, %v511_v40  ;;  %v3625_v5 = vcombine.high %v516_v59, %v520_v60  ;;  %v3624_v0 = vcombine.low %v516_v59, %v520_v60 }
 0x123   : > { %2044 = vmatmul.mubr.bf16.gmra.mxu0 %v3582_v6  ;;  %2333 = vmatmul.mubr.bf16.gmra.mxu1 %v3584_v7 }
 0x124   : > { %2051 = vmatprep.mubr.bf16.mxu0 %v3591_v8  ;;  %2340 = vmatprep.mubr.bf16.mxu1 %v3593_v9 }
 0x12b   : > { %v1861_v18 = vpop.f32.mrf.mxu0  ;;  %2052 = vmatmul.mubr.bf16.gmra.mxu0 %v3590_v14  ;;  %v2150_v19 = vpop.f32.mrf.mxu1  ;;  %2341 = vmatmul.mubr.bf16.gmra.mxu1 %v3592_v15  ;;  %v527_v14 = vld [vmem:[%s4009_s15 + $0x760] sm:$0xff]  ;;  %v524_v15 = vld [vmem:[%s4009_s15 + $0x748] sm:$0xff] }
 0x12c   : > { %v4263_v20 = vadd.f32 %v2150_v19, %v1861_v18  ;;  %2059 = vmatprep.mubr.bf16.mxu0 %v3599_v16  ;;  %2348 = vmatprep.mubr.bf16.mxu1 %v3601_v17  ;;  %v528_v16 = vld [vmem:[%s4009_s15 + $0x768] sm:$0xff]  ;;  %v3622_v19 = vcombine.low %v515_v55, %v519_v58 }
 0x12d   : > { %v1863_v21 = vpop.f32.mrf.mxu0  ;;  %v2152_v22 = vpop.f32.mrf.mxu1  ;;  %v3633_v23 = vcombine.high %v524_v15, %v528_v16  ;;  %v544_v55 = vld [vmem:[%s4009_s15 + $0x7e8] sm:$0xff] }
 0x12e   : > { %v3631_v22 = vcombine.high %v523_v11, %v527_v14 }
 0x12f   : > { %v1864_v25 = vpop.f32.mrf.mxu0  ;;  %v2153_v26 = vpop.f32.mrf.mxu1 }
 0x130   : > { %v4269_v29 = vadd.f32 %v2153_v26, %v1864_v25 }
 0x131   : > { %v1866_v32 = vpop.f32.mrf.mxu0  ;;  %v2155_v33 = vpop.f32.mrf.mxu1 }
 0x132   : > { %v535_v32 = vld [vmem:[%s4009_s15 + $0x7a0] sm:$0xff]  ;;  %v532_v33 = vld [vmem:[%s4009_s15 + $0x788] sm:$0xff] }
 0x133   : > { %v1869_v34 = vpop.f32.mrf.mxu0  ;;  %2060 = vmatmul.mubr.bf16.gmra.mxu0 %v3598_v27  ;;  %v2158_v35 = vpop.f32.mrf.mxu1  ;;  %2349 = vmatmul.mubr.bf16.gmra.mxu1 %v3600_v28  ;;  %v531_v28 = vld [vmem:[%s4009_s15 + $0x780] sm:$0xff] }
 0x134   : > { %v4271_v36 = vadd.f32 %v2158_v35, %v1869_v34  ;;  %2067 = vmatprep.mubr.bf16.mxu0 %v3607_v30  ;;  %2356 = vmatprep.mubr.bf16.mxu1 %v3609_v31  ;;  %v536_v34 = vld [vmem:[%s4009_s15 + $0x7a8] sm:$0xff]  ;;  %v3639_v41 = vcombine.high %v531_v28, %v535_v32  ;;  %v3638_v58 = vcombine.low %v531_v28, %v535_v32  ;;  %v302_v32 = vld [vmem:[%s4009_s15 + $0x58] sm:$0xff] }
 0x135   : > { %v1871_v38 = vpop.f32.mrf.mxu0  ;;  %v2160_v39 = vpop.f32.mrf.mxu1  ;;  %v3641_v42 = vcombine.high %v532_v33, %v536_v34  ;;  %v3640_v59 = vcombine.low %v532_v33, %v536_v34  ;;  %v306_v33 = vld [vmem:[%s4009_s15 + $0x78] sm:$0xff] }
 0x136   : > { %v3630_v38 = vcombine.low %v523_v11, %v527_v14  ;;  %v3632_v39 = vcombine.low %v524_v15, %v528_v16  ;;  %v297_v11 = vld [vmem:[%s4009_s15 + $0x30] sm:$0xff] }
 0x137   : > { %v1872_v43 = vpop.f32.mrf.mxu0  ;;  %v2161_v44 = vpop.f32.mrf.mxu1 }
 0x138   : > { %v4277_v47 = vadd.f32 %v2161_v44, %v1872_v43 }
 0x139   : > { %v1874_v50 = vpop.f32.mrf.mxu0  ;;  %v2163_v51 = vpop.f32.mrf.mxu1 }
 0x13b   : > { %v1877_v52 = vpop.f32.mrf.mxu0  ;;  %2068 = vmatmul.mubr.bf16.gmra.mxu0 %v3606_v45  ;;  %v2166_v53 = vpop.f32.mrf.mxu1  ;;  %2357 = vmatmul.mubr.bf16.gmra.mxu1 %v3608_v46 }
 0x13c   : > { %v4279_v54 = vadd.f32 %v2166_v53, %v1877_v52  ;;  %2075 = vmatprep.mubr.bf16.mxu0 %v3615_v48  ;;  %2364 = vmatprep.mubr.bf16.mxu1 %v3617_v49  ;;  %v539_v49 = vld [vmem:[%s4009_s15 + $0x7c0] sm:$0xff]  ;;  %v540_v53 = vld [vmem:[%s4009_s15 + $0x7c8] sm:$0xff] }
 0x13d   : > { %v1879_v56 = vpop.f32.mrf.mxu0  ;;  %v2168_v57 = vpop.f32.mrf.mxu1  ;;  %v543_v52 = vld [vmem:[%s4009_s15 + $0x7e0] sm:$0xff] }
 0x13e   : > { %v3646_v16 = vcombine.low %v539_v49, %v543_v52 }
 0x13f   : > { %v1880_v61 = vpop.f32.mrf.mxu0  ;;  %v2169_v62 = vpop.f32.mrf.mxu1 }
 0x140   : > { %v4285_v3 = vadd.f32 %v2169_v62, %v1880_v61  ;;  %v3647_v61 = vcombine.high %v539_v49, %v543_v52  ;;  %v3649_v62 = vcombine.high %v540_v53, %v544_v55 }
 0x141   : > { %v1882_v6 = vpop.f32.mrf.mxu0  ;;  %v2171_v7 = vpop.f32.mrf.mxu1 }
 0x142   : > { %v293_v7 = vld [vmem:[%s4009_s15 + $0x10] sm:$0xff] }
 0x143   : > { %v1885_v8 = vpop.f32.mrf.mxu0  ;;  %2076 = vmatmul.mubr.bf16.gmra.mxu0 %v3614_v63  ;;  %v2174_v9 = vpop.f32.mrf.mxu1  ;;  %2365 = vmatmul.mubr.bf16.gmra.mxu1 %v3616_v2 }
 0x144   : > { %v4287_v10 = vadd.f32 %v2174_v9, %v1885_v8  ;;  %2083 = vmatprep.mubr.bf16.mxu0 %v3623_v4  ;;  %2372 = vmatprep.mubr.bf16.mxu1 %v3625_v5 }
 0x145   : > { %v1887_v12 = vpop.f32.mrf.mxu0  ;;  %v2176_v13 = vpop.f32.mrf.mxu1 }
 0x146   : > { %v294_v12 = vld [vmem:[%s4009_s15 + $0x18] sm:$0xff] }
 0x147   : > { %v1888_v17 = vpop.f32.mrf.mxu0  ;;  %v2177_v18 = vpop.f32.mrf.mxu1  ;;  %v298_v13 = vld [vmem:[%s4009_s15 + $0x38] sm:$0xff] }
 0x148   : > { %v4293_v21 = vadd.f32 %v2177_v18, %v1888_v17  ;;  %v3648_v17 = vcombine.low %v540_v53, %v544_v55  ;;  %v313_v53 = vld [vmem:[%s4009_s15 + $0xb0] sm:$0xff]  ;;  %v310_v55 = vld [vmem:[%s4009_s15 + $0x98] sm:$0xff] }
 0x149   : > { %v1890_v24 = vpop.f32.mrf.mxu0  ;;  %v2179_v1 = vpop.f32.mrf.mxu1 }
 0x14b   : > { %v1893_v25 = vpop.f32.mrf.mxu0  ;;  %2084 = vmatmul.mubr.bf16.gmra.mxu0 %v3622_v19  ;;  %v2182_v26 = vpop.f32.mrf.mxu1  ;;  %2373 = vmatmul.mubr.bf16.gmra.mxu1 %v3624_v0  ;;  %v3403_v19 = vcombine.high %v293_v7, %v297_v11  ;;  %v3405_v0 = vcombine.high %v294_v12, %v298_v13 }
 0x14c   : > { %v4295_v27 = vadd.f32 %v2182_v26, %v1893_v25  ;;  %2091 = vmatprep.mubr.bf16.mxu0 %v3631_v22  ;;  %2380 = vmatprep.mubr.bf16.mxu1 %v3633_v23  ;;  %v301_v26 = vld [vmem:[%s4009_s15 + $0x50] sm:$0xff] }
 0x14d   : > { %v1895_v30 = vpop.f32.mrf.mxu0  ;;  %v2184_v31 = vpop.f32.mrf.mxu1 }
 0x14e   : > { %v305_v31 = vld [vmem:[%s4009_s15 + $0x70] sm:$0xff] }
 0x14f   : > { %v1896_v35 = vpop.f32.mrf.mxu0  ;;  %v2185_v37 = vpop.f32.mrf.mxu1 }
 0x150   : > { %v4301_v40 = vadd.f32 %v2185_v37, %v1896_v35  ;;  %v3402_v37 = vcombine.low %v293_v7, %v297_v11  ;;  %v317_v11 = vld [vmem:[%s4009_s15 + $0xd0] sm:$0xff] }
 0x151   : > { %v1898_v43 = vpop.f32.mrf.mxu0  ;;  %v2187_v44 = vpop.f32.mrf.mxu1 }
 0x153   : > { %v1901_v45 = vpop.f32.mrf.mxu0  ;;  %2092 = vmatmul.mubr.bf16.gmra.mxu0 %v3630_v38  ;;  %v2190_v46 = vpop.f32.mrf.mxu1  ;;  %2381 = vmatmul.mubr.bf16.gmra.mxu1 %v3632_v39  ;;  %v3404_v38 = vcombine.low %v294_v12, %v298_v13 }
 0x154   : > { %v4303_v48 = vadd.f32 %v2190_v46, %v1901_v45  ;;  %2099 = vmatprep.mubr.bf16.mxu0 %v3639_v41  ;;  %2388 = vmatprep.mubr.bf16.mxu1 %v3641_v42  ;;  %v3411_v41 = vcombine.high %v301_v26, %v305_v31  ;;  %v3413_v42 = vcombine.high %v302_v32, %v306_v33 }
 0x155   : > { %v1903_v50 = vpop.f32.mrf.mxu0  ;;  %v2192_v51 = vpop.f32.mrf.mxu1 }
 0x156   : > { %v309_v50 = vld [vmem:[%s4009_s15 + $0x90] sm:$0xff] }
 0x157   : > { %v1904_v56 = vpop.f32.mrf.mxu0  ;;  %v2193_v57 = vpop.f32.mrf.mxu1 }
 0x158   : > { %v4309_v60 = vadd.f32 %v2193_v57, %v1904_v56  ;;  %v314_v56 = vld [vmem:[%s4009_s15 + $0xb8] sm:$0xff] }
 0x159   : > { %v1906_v63 = vpop.f32.mrf.mxu0  ;;  %v2195_v2 = vpop.f32.mrf.mxu1 }
 0x15a   : > { %v3419_v63 = vcombine.high %v309_v50, %v313_v53  ;;  %v3421_v2 = vcombine.high %v310_v55, %v314_v56 }
 0x15b   : > { %v1909_v4 = vpop.f32.mrf.mxu0  ;;  %2100 = vmatmul.mubr.bf16.gmra.mxu0 %v3638_v58  ;;  %v2198_v5 = vpop.f32.mrf.mxu1  ;;  %2389 = vmatmul.mubr.bf16.gmra.mxu1 %v3640_v59  ;;  %v3410_v59 = vcombine.low %v301_v26, %v305_v31 }
 0x15c   : > { %v4311_v6 = vadd.f32 %v2198_v5, %v1909_v4  ;;  %2107 = vmatprep.mubr.bf16.mxu0 %v3647_v61  ;;  %2396 = vmatprep.mubr.bf16.mxu1 %v3649_v62  ;;  %v3412_v61 = vcombine.low %v302_v32, %v306_v33  ;;  %v325_v33 = vld [vmem:[%s4009_s15 + $0x110] sm:$0xff] }
 0x15d   : > { %v1911_v8 = vpop.f32.mrf.mxu0  ;;  %v2200_v9 = vpop.f32.mrf.mxu1 }
 0x15f   : > { %v1912_v14 = vpop.f32.mrf.mxu0  ;;  %v2201_v15 = vpop.f32.mrf.mxu1 }
 0x160   : > { %v4317_v18 = vadd.f32 %v2201_v15, %v1912_v14  ;;  %v321_v14 = vld [vmem:[%s4009_s15 + $0xf0] sm:$0xff]  ;;  %v318_v15 = vld [vmem:[%s4009_s15 + $0xd8] sm:$0xff] }
 0x161   : > { %v1914_v22 = vpop.f32.mrf.mxu0  ;;  %v2203_v23 = vpop.f32.mrf.mxu1 }
 0x162   : > { %v3420_v22 = vcombine.low %v310_v55, %v314_v56 }
 0x163   : > { %v1917_v24 = vpop.f32.mrf.mxu0  ;;  %2108 = vmatmul.mubr.bf16.gmra.mxu0 %v3646_v16  ;;  %v2206_v1 = vpop.f32.mrf.mxu1  ;;  %2397 = vmatmul.mubr.bf16.gmra.mxu1 %v3648_v17  ;;  %v322_v16 = vld [vmem:[%s4009_s15 + $0xf8] sm:$0xff] }
 0x164   : > { %v4319_v25 = vadd.f32 %v2206_v1, %v1917_v24  ;;  %2437 = vmatprep.mubr.bf16.mxu0 %v3403_v19  ;;  %2726 = vmatprep.mubr.bf16.mxu1 %v3405_v0  ;;  %v3418_v0 = vcombine.low %v309_v50, %v313_v53  ;;  %v3427_v24 = vcombine.high %v317_v11, %v321_v14 }
 0x165   : > { %v1919_v28 = vpop.f32.mrf.mxu0  ;;  %v2208_v30 = vpop.f32.mrf.mxu1  ;;  %v3429_v1 = vcombine.high %v318_v15, %v322_v16 }
 0x167   : > { %v1920_v34 = vpop.f32.mrf.mxu0  ;;  %v2209_v35 = vpop.f32.mrf.mxu1 }
 0x168   : > { %v4325_v39 = vadd.f32 %v2209_v35, %v1920_v34 }
 0x169   : > { %v1922_v43 = vpop.f32.mrf.mxu0  ;;  %v2211_v44 = vpop.f32.mrf.mxu1 }
 0x16a   : > { %v3426_v44 = vcombine.low %v317_v11, %v321_v14 }
 0x16b   : > { %v1925_v45 = vpop.f32.mrf.mxu0  ;;  %v2214_v46 = vpop.f32.mrf.mxu1  ;;  %2438 = vmatmul.mubr.bf16.vlgmr.msra.gmra.mxu0 %v3402_v37  ;;  %2727 = vmatmul.mubr.bf16.vlgmr.msra.gmra.mxu1 %v3404_v38  ;;  %v329_v37 = vld [vmem:[%s4009_s15 + $0x130] sm:$0xff]  ;;  %v326_v38 = vld [vmem:[%s4009_s15 + $0x118] sm:$0xff] }
 0x16c   : > { %v4327_v49 = vadd.f32 %v2214_v46, %v1925_v45  ;;  %2445 = vmatprep.mubr.bf16.mxu0 %v3411_v41  ;;  %2734 = vmatprep.mubr.bf16.mxu1 %v3413_v42  ;;  %v330_v41 = vld [vmem:[%s4009_s15 + $0x138] sm:$0xff]  ;;  %v3428_v45 = vcombine.low %v318_v15, %v322_v16  ;;  %v3435_v50 = vcombine.high %v325_v33, %v329_v37 }
 0x16d   : > { %v1927_v51 = vpop.f32.mrf.mxu0  ;;  %v2216_v52 = vpop.f32.mrf.mxu1  ;;  %v3436_v11 = vcombine.low %v326_v38, %v330_v41 }
 0x16e   : > { %v3437_v51 = vcombine.high %v326_v38, %v330_v41 }
 0x16f   : > { %v1928_v57 = vpop.f32.mrf.mxu0  ;;  %v2217_v58 = vpop.f32.mrf.mxu1 }
 0x170   : > { %v4333_v62 = vadd.f32 %v2217_v58, %v1928_v57  ;;  %v333_v58 = vld [vmem:[%s4009_s15 + $0x150] sm:$0xff] }
 0x171   : > { %v1930_v4 = vpop.f32.mrf.mxu0  ;;  %v2219_v5 = vpop.f32.mrf.mxu1 }
 0x172   : > { %v338_v4 = vld [vmem:[%s4009_s15 + $0x178] sm:$0xff] }
 0x173   : > { %v1933_v7 = vpop.f32.mrf.mxu0  ;;  %v2222_v8 = vpop.f32.mrf.mxu1  ;;  %2446 = vmatmul.mubr.bf16.gmra.mxu0 %v3410_v59  ;;  %2735 = vmatmul.mubr.bf16.gmra.mxu1 %v3412_v61 }
 0x174   : > { %v4335_v9 = vadd.f32 %v2222_v8, %v1933_v7  ;;  %2453 = vmatprep.mubr.bf16.mxu0 %v3419_v63  ;;  %2742 = vmatprep.mubr.bf16.mxu1 %v3421_v2  ;;  %v337_v63 = vld [vmem:[%s4009_s15 + $0x170] sm:$0xff]  ;;  %v334_v2 = vld [vmem:[%s4009_s15 + $0x158] sm:$0xff]  ;;  %v3434_v8 = vcombine.low %v325_v33, %v329_v37 }
 0x175   : > { %v1935_v12 = vpop.f32.mrf.mxu0  ;;  %v2224_v13 = vpop.f32.mrf.mxu1  ;;  %v3445_v14 = vcombine.high %v334_v2, %v338_v4 }
 0x176   : > { %v3443_v13 = vcombine.high %v333_v58, %v337_v63 }
 0x177   : > { %v1936_v17 = vpop.f32.mrf.mxu0  ;;  %v2225_v19 = vpop.f32.mrf.mxu1 }
 0x178   : > { %v4341_v23 = vadd.f32 %v2225_v19, %v1936_v17 }
 0x179   : > { %v1938_v26 = vpop.f32.mrf.mxu0  ;;  %v2227_v28 = vpop.f32.mrf.mxu1 }
 0x17a   : > { %v345_v26 = vld [vmem:[%s4009_s15 + $0x1b0] sm:$0xff]  ;;  %v342_v28 = vld [vmem:[%s4009_s15 + $0x198] sm:$0xff] }
 0x17b   : > { %v1941_v30 = vpop.f32.mrf.mxu0  ;;  %v2230_v31 = vpop.f32.mrf.mxu1  ;;  %2454 = vmatmul.mubr.bf16.gmra.mxu0 %v3418_v0  ;;  %2743 = vmatmul.mubr.bf16.gmra.mxu1 %v3420_v22  ;;  %v341_v22 = vld [vmem:[%s4009_s15 + $0x190] sm:$0xff] }
 0x17c   : > { %v4343_v32 = vadd.f32 %v2230_v31, %v1941_v30  ;;  %2461 = vmatprep.mubr.bf16.mxu0 %v3427_v24  ;;  %2750 = vmatprep.mubr.bf16.mxu1 %v3429_v1  ;;  %v346_v30 = vld [vmem:[%s4009_s15 + $0x1b8] sm:$0xff]  ;;  %v3451_v38 = vcombine.high %v341_v22, %v345_v26 }
 0x17d   : > { %v1943_v34 = vpop.f32.mrf.mxu0  ;;  %v2232_v35 = vpop.f32.mrf.mxu1  ;;  %v3453_v41 = vcombine.high %v342_v28, %v346_v30 }
 0x17e   : > { %v3442_v34 = vcombine.low %v333_v58, %v337_v63  ;;  %v3444_v35 = vcombine.low %v334_v2, %v338_v4  ;;  %v354_v58 = vld [vmem:[%s4009_s15 + $0x1f8] sm:$0xff]  ;;  %v3450_v63 = vcombine.low %v341_v22, %v345_v26  ;;  %v3452_v2 = vcombine.low %v342_v28, %v346_v30  ;;  %v361_v22 = vld [vmem:[%s4009_s15 + $0x230] sm:$0xff] }
 0x17f   : > { %v1944_v42 = vpop.f32.mrf.mxu0  ;;  %v2233_v43 = vpop.f32.mrf.mxu1 }
 0x180   : > { %v4349_v46 = vadd.f32 %v2233_v43, %v1944_v42 }
 0x181   : > { %v1946_v52 = vpop.f32.mrf.mxu0  ;;  %v2235_v53 = vpop.f32.mrf.mxu1 }
 0x183   : > { %v1949_v55 = vpop.f32.mrf.mxu0  ;;  %v2238_v56 = vpop.f32.mrf.mxu1  ;;  %2462 = vmatmul.mubr.bf16.gmra.mxu0 %v3426_v44  ;;  %2751 = vmatmul.mubr.bf16.gmra.mxu1 %v3428_v45 }
 0x184   : > { %v4351_v57 = vadd.f32 %v2238_v56, %v1949_v55  ;;  %2469 = vmatprep.mubr.bf16.mxu0 %v3435_v50  ;;  %2758 = vmatprep.mubr.bf16.mxu1 %v3437_v51  ;;  %v349_v51 = vld [vmem:[%s4009_s15 + $0x1d0] sm:$0xff]  ;;  %v350_v56 = vld [vmem:[%s4009_s15 + $0x1d8] sm:$0xff] }
 0x185   : > { %v1951_v59 = vpop.f32.mrf.mxu0  ;;  %v2240_v61 = vpop.f32.mrf.mxu1  ;;  %v353_v55 = vld [vmem:[%s4009_s15 + $0x1f0] sm:$0xff] }
 0x186   : > { %v3458_v30 = vcombine.low %v349_v51, %v353_v55 }
 0x187   : > { %v1952_v5 = vpop.f32.mrf.mxu0  ;;  %v2241_v7 = vpop.f32.mrf.mxu1 }
 0x188   : > { %v4357_v12 = vadd.f32 %v2241_v7, %v1952_v5  ;;  %v3459_v5 = vcombine.high %v349_v51, %v353_v55  ;;  %v3461_v7 = vcombine.high %v350_v56, %v354_v58  ;;  %v366_v55 = vld [vmem:[%s4009_s15 + $0x258] sm:$0xff] }
 0x189   : > { %v1954_v15 = vpop.f32.mrf.mxu0  ;;  %v2243_v16 = vpop.f32.mrf.mxu1 }
 0x18a   : > { %v357_v16 = vld [vmem:[%s4009_s15 + $0x210] sm:$0xff] }
 0x18b   : > { %v1957_v17 = vpop.f32.mrf.mxu0  ;;  %v2246_v19 = vpop.f32.mrf.mxu1  ;;  %2470 = vmatmul.mubr.bf16.gmra.mxu0 %v3434_v8  ;;  %2759 = vmatmul.mubr.bf16.gmra.mxu1 %v3436_v11 }
 0x18c   : > { %v4359_v0 = vadd.f32 %v2246_v19, %v1957_v17  ;;  %2477 = vmatprep.mubr.bf16.mxu0 %v3443_v13  ;;  %2766 = vmatprep.mubr.bf16.mxu1 %v3445_v14 }
 0x18d   : > { %v1959_v24 = vpop.f32.mrf.mxu0  ;;  %v2248_v1 = vpop.f32.mrf.mxu1 }
 0x18e   : > { %v358_v24 = vld [vmem:[%s4009_s15 + $0x218] sm:$0xff] }
 0x18f   : > { %v1960_v31 = vpop.f32.mrf.mxu0  ;;  %v2249_v33 = vpop.f32.mrf.mxu1  ;;  %v362_v1 = vld [vmem:[%s4009_s15 + $0x238] sm:$0xff] }
 0x190   : > { %v4365_v37 = vadd.f32 %v2249_v33, %v1960_v31  ;;  %v3460_v31 = vcombine.low %v350_v56, %v354_v58  ;;  %v370_v56 = vld [vmem:[%s4009_s15 + $0x278] sm:$0xff] }
 0x191   : > { %v1962_v42 = vpop.f32.mrf.mxu0  ;;  %v2251_v43 = vpop.f32.mrf.mxu1 }
 0x193   : > { %v1965_v44 = vpop.f32.mrf.mxu0  ;;  %v2254_v45 = vpop.f32.mrf.mxu1  ;;  %2478 = vmatmul.mubr.bf16.gmra.mxu0 %v3442_v34  ;;  %2767 = vmatmul.mubr.bf16.gmra.mxu1 %v3444_v35  ;;  %v3467_v34 = vcombine.high %v357_v16, %v361_v22  ;;  %v3469_v35 = vcombine.high %v358_v24, %v362_v1 }
 0x194   : > { %v4367_v50 = vadd.f32 %v2254_v45, %v1965_v44  ;;  %2485 = vmatprep.mubr.bf16.mxu0 %v3451_v38  ;;  %2774 = vmatprep.mubr.bf16.mxu1 %v3453_v41  ;;  %v365_v45 = vld [vmem:[%s4009_s15 + $0x250] sm:$0xff] }
 0x195   : > { %v1967_v52 = vpop.f32.mrf.mxu0  ;;  %v2256_v53 = vpop.f32.mrf.mxu1 }
 0x196   : > { %v369_v53 = vld [vmem:[%s4009_s15 + $0x270] sm:$0xff] }
 0x197   : > { %v1968_v59 = vpop.f32.mrf.mxu0  ;;  %v2257_v61 = vpop.f32.mrf.mxu1 }
 0x198   : > { %v4373_v4 = vadd.f32 %v2257_v61, %v1968_v59  ;;  %v3466_v61 = vcombine.low %v357_v16, %v361_v22 }
 0x199   : > { %v1970_v8 = vpop.f32.mrf.mxu0  ;;  %v2259_v11 = vpop.f32.mrf.mxu1 }
 0x19b   : > { %v1973_v13 = vpop.f32.mrf.mxu0  ;;  %v2262_v14 = vpop.f32.mrf.mxu1  ;;  %2486 = vmatmul.mubr.bf16.gmra.mxu0 %v3450_v63  ;;  %2775 = vmatmul.mubr.bf16.gmra.mxu1 %v3452_v2  ;;  %v3468_v63 = vcombine.low %v358_v24, %v362_v1  ;;  %v377_v24 = vld [vmem:[%s4009_s15 + $0x2b0] sm:$0xff]  ;;  %v374_v1 = vld [vmem:[%s4009_s15 + $0x298] sm:$0xff] }
 0x19c   : > { %v4375_v15 = vadd.f32 %v2262_v14, %v1973_v13  ;;  %2493 = vmatprep.mubr.bf16.mxu0 %v3459_v5  ;;  %2782 = vmatprep.mubr.bf16.mxu1 %v3461_v7  ;;  %v3475_v5 = vcombine.high %v365_v45, %v369_v53  ;;  %v3477_v7 = vcombine.high %v366_v55, %v370_v56 }
 0x19d   : > { %v1975_v17 = vpop.f32.mrf.mxu0  ;;  %v2264_v19 = vpop.f32.mrf.mxu1 }
 0x19e   : > { %v373_v19 = vld [vmem:[%s4009_s15 + $0x290] sm:$0xff] }
 0x19f   : > { %v1976_v26 = vpop.f32.mrf.mxu0  ;;  %v2265_v28 = vpop.f32.mrf.mxu1 }
 0x1a0   : > { %v4381_v33 = vadd.f32 %v2265_v28, %v1976_v26  ;;  %v378_v26 = vld [vmem:[%s4009_s15 + $0x2b8] sm:$0xff] }
 0x1a1   : > { %v1978_v38 = vpop.f32.mrf.mxu0  ;;  %v2267_v41 = vpop.f32.mrf.mxu1 }
 0x1a2   : > { %v3483_v38 = vcombine.high %v373_v19, %v377_v24  ;;  %v3485_v41 = vcombine.high %v374_v1, %v378_v26 }
 0x1a3   : > { %v1981_v42 = vpop.f32.mrf.mxu0  ;;  %v2270_v43 = vpop.f32.mrf.mxu1  ;;  %2494 = vmatmul.mubr.bf16.gmra.mxu0 %v3458_v30  ;;  %2783 = vmatmul.mubr.bf16.gmra.mxu1 %v3460_v31  ;;  %v3474_v31 = vcombine.low %v365_v45, %v369_v53 }
 0x1a4   : > { %v4383_v44 = vadd.f32 %v2270_v43, %v1981_v42  ;;  %2501 = vmatprep.mubr.bf16.mxu0 %v3467_v34  ;;  %2790 = vmatprep.mubr.bf16.mxu1 %v3469_v35  ;;  %v3476_v34 = vcombine.low %v366_v55, %v370_v56  ;;  %v385_v55 = vld [vmem:[%s4009_s15 + $0x2f0] sm:$0xff]  ;;  %v382_v56 = vld [vmem:[%s4009_s15 + $0x2d8] sm:$0xff] }
 0x1a5   : > { %v1983_v51 = vpop.f32.mrf.mxu0  ;;  %v2272_v52 = vpop.f32.mrf.mxu1 }
 0x1a7   : > { %v1984_v58 = vpop.f32.mrf.mxu0  ;;  %v2273_v59 = vpop.f32.mrf.mxu1 }
 0x1a8   : > { %v4389_v2 = vadd.f32 %v2273_v59, %v1984_v58  ;;  %v381_v59 = vld [vmem:[%s4009_s15 + $0x2d0] sm:$0xff] }
 0x1a9   : > { %v1986_v8 = vpop.f32.mrf.mxu0  ;;  %v2275_v11 = vpop.f32.mrf.mxu1 }
 0x1aa   : > { %v3484_v8 = vcombine.low %v374_v1, %v378_v26  ;;  %v393_v1 = vld [vmem:[%s4009_s15 + $0x330] sm:$0xff]  ;;  %v390_v26 = vld [vmem:[%s4009_s15 + $0x318] sm:$0xff] }
 0x1ab   : > { %v1989_v13 = vpop.f32.mrf.mxu0  ;;  %v2278_v14 = vpop.f32.mrf.mxu1  ;;  %2502 = vmatmul.mubr.bf16.gmra.mxu0 %v3466_v61  ;;  %2791 = vmatmul.mubr.bf16.gmra.mxu1 %v3468_v63  ;;  %v386_v61 = vld [vmem:[%s4009_s15 + $0x2f8] sm:$0xff] }
 0x1ac   : > { %v4391_v17 = vadd.f32 %v2278_v14, %v1989_v13  ;;  %2509 = vmatprep.mubr.bf16.mxu0 %v3475_v5  ;;  %2798 = vmatprep.mubr.bf16.mxu1 %v3477_v7  ;;  %v3482_v7 = vcombine.low %v373_v19, %v377_v24  ;;  %v3491_v13 = vcombine.high %v381_v59, %v385_v55 }
 0x1ad   : > { %v1991_v16 = vpop.f32.mrf.mxu0  ;;  %v2280_v22 = vpop.f32.mrf.mxu1  ;;  %v3493_v14 = vcombine.high %v382_v56, %v386_v61 }
 0x1af   : > { %v1992_v28 = vpop.f32.mrf.mxu0  ;;  %v2281_v30 = vpop.f32.mrf.mxu1 }
 0x1b0   : > { %v4397_v35 = vadd.f32 %v2281_v30, %v1992_v28 }
 0x1b1   : > { %v1994_v42 = vpop.f32.mrf.mxu0  ;;  %v2283_v43 = vpop.f32.mrf.mxu1 }
 0x1b2   : > { %v3490_v43 = vcombine.low %v381_v59, %v385_v55 }
 0x1b3   : > { %v1997_v51 = vpop.f32.mrf.mxu0  ;;  %v2286_v52 = vpop.f32.mrf.mxu1  ;;  %2510 = vmatmul.mubr.bf16.gmra.mxu0 %v3474_v31  ;;  %2799 = vmatmul.mubr.bf16.gmra.mxu1 %v3476_v34  ;;  %v389_v34 = vld [vmem:[%s4009_s15 + $0x310] sm:$0xff] }
 0x1b4   : > { %v4399_v58 = vadd.f32 %v2286_v52, %v1997_v51  ;;  %2517 = vmatprep.mubr.bf16.mxu0 %v3483_v38  ;;  %2806 = vmatprep.mubr.bf16.mxu1 %v3485_v41  ;;  %v394_v38 = vld [vmem:[%s4009_s15 + $0x338] sm:$0xff]  ;;  %v3492_v51 = vcombine.low %v382_v56, %v386_v61  ;;  %v401_v56 = vld [vmem:[%s4009_s15 + $0x370] sm:$0xff] }
 0x1b5   : > { %v1999_v45 = vpop.f32.mrf.mxu0  ;;  %v2288_v53 = vpop.f32.mrf.mxu1  ;;  %v398_v61 = vld [vmem:[%s4009_s15 + $0x358] sm:$0xff] }
 0x1b6   : > { %v3499_v45 = vcombine.high %v389_v34, %v393_v1  ;;  %v3501_v53 = vcombine.high %v390_v26, %v394_v38 }
 0x1b7   : > { %v2000_v63 = vpop.f32.mrf.mxu0  ;;  %v2289_v5 = vpop.f32.mrf.mxu1 }
 0x1b8   : > { %v4405_v11 = vadd.f32 %v2289_v5, %v2000_v63 }
 0x1b9   : > { %v2002_v16 = vpop.f32.mrf.mxu0  ;;  %v2291_v22 = vpop.f32.mrf.mxu1 }
 0x1ba   : > { %v402_v16 = vld [vmem:[%s4009_s15 + $0x378] sm:$0xff] }
 0x1bb   : > { %v2005_v28 = vpop.f32.mrf.mxu0  ;;  %v2294_v30 = vpop.f32.mrf.mxu1  ;;  %2518 = vmatmul.mubr.bf16.gmra.mxu0 %v3482_v7  ;;  %2807 = vmatmul.mubr.bf16.gmra.mxu1 %v3484_v8 }
 0x1bc   : > { %v4407_v31 = vadd.f32 %v2294_v30, %v2005_v28  ;;  %2525 = vmatprep.mubr.bf16.mxu0 %v3491_v13  ;;  %2814 = vmatprep.mubr.bf16.mxu1 %v3493_v14  ;;  %v397_v14 = vld [vmem:[%s4009_s15 + $0x350] sm:$0xff]  ;;  %v3498_v30 = vcombine.low %v389_v34, %v393_v1 }
 0x1bd   : > { %v2007_v19 = vpop.f32.mrf.mxu0  ;;  %v2296_v24 = vpop.f32.mrf.mxu1 }
 0x1be   : > { %v3500_v19 = vcombine.low %v390_v26, %v394_v38  ;;  %v409_v26 = vld [vmem:[%s4009_s15 + $0x3b0] sm:$0xff]  ;;  %v406_v38 = vld [vmem:[%s4009_s15 + $0x398] sm:$0xff] }
 0x1bf   : > { %v2008_v41 = vpop.f32.mrf.mxu0  ;;  %v2297_v42 = vpop.f32.mrf.mxu1 }
 0x1c0   : > { %v4413_v52 = vadd.f32 %v2297_v42, %v2008_v41  ;;  %v3507_v41 = vcombine.high %v397_v14, %v401_v56  ;;  %v3509_v42 = vcombine.high %v398_v61, %v402_v16 }
 0x1c1   : > { %v2010_v63 = vpop.f32.mrf.mxu0  ;;  %v2299_v5 = vpop.f32.mrf.mxu1 }
 0x1c2   : > { %v405_v5 = vld [vmem:[%s4009_s15 + $0x390] sm:$0xff] }
 0x1c3   : > { %v2013_v7 = vpop.f32.mrf.mxu0  ;;  %v2302_v8 = vpop.f32.mrf.mxu1  ;;  %2526 = vmatmul.mubr.bf16.gmra.mxu0 %v3490_v43  ;;  %2815 = vmatmul.mubr.bf16.gmra.mxu1 %v3492_v51 }
 0x1c4   : > { %v4415_v13 = vadd.f32 %v2302_v8, %v2013_v7  ;;  %2533 = vmatprep.mubr.bf16.mxu0 %v3499_v45  ;;  %2822 = vmatprep.mubr.bf16.mxu1 %v3501_v53  ;;  %v410_v7 = vld [vmem:[%s4009_s15 + $0x3b8] sm:$0xff] }
 0x1c5   : > { %v2015_v59 = vpop.f32.mrf.mxu0  ;;  %v2304_v55 = vpop.f32.mrf.mxu1 }
 0x1c6   : > { %v3506_v55 = vcombine.low %v397_v14, %v401_v56 }
 0x1c7   : > { %v2016_v22 = vpop.f32.mrf.mxu0  ;;  %v2305_v28 = vpop.f32.mrf.mxu1 }
 0x1c8   : > { %v4421_v24 = vadd.f32 %v2305_v28, %v2016_v22  ;;  %v3508_v22 = vcombine.low %v398_v61, %v402_v16  ;;  %v417_v61 = vld [vmem:[%s4009_s15 + $0x3f0] sm:$0xff]  ;;  %v414_v16 = vld [vmem:[%s4009_s15 + $0x3d8] sm:$0xff] }
 0x1c9   : > { %v2018_v43 = vpop.f32.mrf.mxu0  ;;  %v2307_v51 = vpop.f32.mrf.mxu1 }
 0x1cb   : > { %v2021_v45 = vpop.f32.mrf.mxu0  ;;  %v2310_v53 = vpop.f32.mrf.mxu1  ;;  %2534 = vmatmul.mubr.bf16.gmra.mxu0 %v3498_v30  ;;  %2823 = vmatmul.mubr.bf16.gmra.mxu1 %v3500_v19  ;;  %v3515_v30 = vcombine.high %v405_v5, %v409_v26  ;;  %v3517_v19 = vcombine.high %v406_v38, %v410_v7 }
 0x1cc   : > { %v4423_v63 = vadd.f32 %v2310_v53, %v2021_v45  ;;  %2541 = vmatprep.mubr.bf16.mxu0 %v3507_v41  ;;  %2830 = vmatprep.mubr.bf16.mxu1 %v3509_v42  ;;  %v413_v53 = vld [vmem:[%s4009_s15 + $0x3d0] sm:$0xff] }
 0x1cd   : > { %v2023_v34 = vpop.f32.mrf.mxu0  ;;  %v2312_v1 = vpop.f32.mrf.mxu1 }
 0x1ce   : > { %v418_v34 = vld [vmem:[%s4009_s15 + $0x3f8] sm:$0xff] }
 0x1cf   : > { %v2024_v8 = vpop.f32.mrf.mxu0  ;;  %v2313_v59 = vpop.f32.mrf.mxu1 }
 0x1d0   : > { %v4429_v28 = vadd.f32 %v2313_v59, %v2024_v8  ;;  %v3514_v59 = vcombine.low %v405_v5, %v409_v26 }
 0x1d1   : > { %v2026_v41 = vpop.f32.mrf.mxu0  ;;  %v2315_v42 = vpop.f32.mrf.mxu1 }
 0x1d2   : > { %v3516_v41 = vcombine.low %v406_v38, %v410_v7  ;;  %v425_v38 = vld [vmem:[%s4009_s15 + $0x430] sm:$0xff]  ;;  %v422_v7 = vld [vmem:[%s4009_s15 + $0x418] sm:$0xff] }
 0x1d3   : > { %v2029_v43 = vpop.f32.mrf.mxu0  ;;  %v2318_v51 = vpop.f32.mrf.mxu1  ;;  %2542 = vmatmul.mubr.bf16.gmra.mxu0 %v3506_v55  ;;  %2831 = vmatmul.mubr.bf16.gmra.mxu1 %v3508_v22  ;;  %v3523_v55 = vcombine.high %v413_v53, %v417_v61  ;;  %v3525_v22 = vcombine.high %v414_v16, %v418_v34 }
 0x1d4   : > { %v4431_v45 = vadd.f32 %v2318_v51, %v2029_v43  ;;  %2549 = vmatprep.mubr.bf16.mxu0 %v3515_v30  ;;  %2838 = vmatprep.mubr.bf16.mxu1 %v3517_v19 }
 0x1d5   : > { %v2031_v14 = vpop.f32.mrf.mxu0  ;;  %v2320_v56 = vpop.f32.mrf.mxu1 }
 0x1d6   : > { %4764 = vst [vmem:[#allocation6_spill] sm:$0xff] %v4431_v45  ;;  %v421_v56 = vld [vmem:[%s4009_s15 + $0x410] sm:$0xff]  ;;  %v3522_v45 = vcombine.low %v413_v53, %v417_v61 }
 0x1d7   : > { %v2032_v1 = vpop.f32.mrf.mxu0  ;;  %v2321_v8 = vpop.f32.mrf.mxu1 }
 0x1d8   : > { %v4437_v42 = vadd.f32 %v2321_v8, %v2032_v1  ;;  %v426_v1 = vld [vmem:[%s4009_s15 + $0x438] sm:$0xff] }
 0x1d9   : > { %v2034_v30 = vpop.f32.mrf.mxu0  ;;  %v2323_v19 = vpop.f32.mrf.mxu1 }
 0x1da   : > { %4765 = vst [vmem:[#allocation7_spill] sm:$0xff] %v4437_v42  ;;  %v3524_v30 = vcombine.low %v414_v16, %v418_v34  ;;  %v433_v16 = vld [vmem:[%s4009_s15 + $0x470] sm:$0xff]  ;;  %v430_v34 = vld [vmem:[%s4009_s15 + $0x458] sm:$0xff] }
 0x1db   : > { %v2037_v43 = vpop.f32.mrf.mxu0  ;;  %v2326_v51 = vpop.f32.mrf.mxu1  ;;  %2550 = vmatmul.mubr.bf16.gmra.mxu0 %v3514_v59  ;;  %2839 = vmatmul.mubr.bf16.gmra.mxu1 %v3516_v41  ;;  %v3531_v59 = vcombine.high %v421_v56, %v425_v38  ;;  %v3533_v41 = vcombine.high %v422_v7, %v426_v1 }
 0x1dc   : > { %v4439_v14 = vadd.f32 %v2326_v51, %v2037_v43  ;;  %2557 = vmatprep.mubr.bf16.mxu0 %v3523_v55  ;;  %2846 = vmatprep.mubr.bf16.mxu1 %v3525_v22 }
 0x1dd   : > { %v2039_v5 = vpop.f32.mrf.mxu0  ;;  %v2328_v26 = vpop.f32.mrf.mxu1 }
 0x1de   : > { %4766 = vst [vmem:[#allocation8_spill] sm:$0xff] %v4439_v14  ;;  %v429_v26 = vld [vmem:[%s4009_s15 + $0x450] sm:$0xff]  ;;  %v3530_v14 = vcombine.low %v421_v56, %v425_v38 }
 0x1df   : > { %v2040_v8 = vpop.f32.mrf.mxu0  ;;  %v2329_v42 = vpop.f32.mrf.mxu1 }
 0x1e0   : > { %v4445_v19 = vadd.f32 %v2329_v42, %v2040_v8  ;;  %v434_v42 = vld [vmem:[%s4009_s15 + $0x478] sm:$0xff] }
 0x1e1   : > { %v2042_v55 = vpop.f32.mrf.mxu0  ;;  %v2331_v22 = vpop.f32.mrf.mxu1 }
 0x1e2   : > { %4767 = vst [vmem:[#allocation9_spill] sm:$0xff] %v4445_v19  ;;  %v3532_v55 = vcombine.low %v422_v7, %v426_v1  ;;  %v441_v7 = vld [vmem:[%s4009_s15 + $0x4b0] sm:$0xff]  ;;  %v438_v1 = vld [vmem:[%s4009_s15 + $0x498] sm:$0xff] }
 0x1e3   : > { %v2045_v43 = vpop.f32.mrf.mxu0  ;;  %v2334_v51 = vpop.f32.mrf.mxu1  ;;  %2558 = vmatmul.mubr.bf16.gmra.mxu0 %v3522_v45  ;;  %2847 = vmatmul.mubr.bf16.gmra.mxu1 %v3524_v30  ;;  %v3539_v45 = vcombine.high %v429_v26, %v433_v16  ;;  %v3541_v30 = vcombine.high %v430_v34, %v434_v42 }
 0x1e4   : > { %v4447_v5 = vadd.f32 %v2334_v51, %v2045_v43  ;;  %2565 = vmatprep.mubr.bf16.mxu0 %v3531_v59  ;;  %2854 = vmatprep.mubr.bf16.mxu1 %v3533_v41 }
 0x1e5   : > { %v2047_v53 = vpop.f32.mrf.mxu0  ;;  %v2336_v61 = vpop.f32.mrf.mxu1 }
 0x1e6   : > { %4768 = vst [vmem:[#allocation10_spill] sm:$0xff] %v4447_v5  ;;  %v437_v61 = vld [vmem:[%s4009_s15 + $0x490] sm:$0xff]  ;;  %v3538_v5 = vcombine.low %v429_v26, %v433_v16 }
 0x1e7   : > { %v2048_v8 = vpop.f32.mrf.mxu0  ;;  %v2337_v19 = vpop.f32.mrf.mxu1 }
 0x1e8   : > { %v4453_v22 = vadd.f32 %v2337_v19, %v2048_v8  ;;  %v442_v19 = vld [vmem:[%s4009_s15 + $0x4b8] sm:$0xff] }
 0x1e9   : > { %v2050_v59 = vpop.f32.mrf.mxu0  ;;  %v2339_v41 = vpop.f32.mrf.mxu1 }
 0x1ea   : > { %4769 = vst [vmem:[#allocation11_spill] sm:$0xff] %v4453_v22  ;;  %v3540_v59 = vcombine.low %v430_v34, %v434_v42  ;;  %v449_v34 = vld [vmem:[%s4009_s15 + $0x4f0] sm:$0xff]  ;;  %v446_v42 = vld [vmem:[%s4009_s15 + $0x4d8] sm:$0xff] }
 0x1eb   : > { %v2053_v43 = vpop.f32.mrf.mxu0  ;;  %v2342_v51 = vpop.f32.mrf.mxu1  ;;  %2566 = vmatmul.mubr.bf16.gmra.mxu0 %v3530_v14  ;;  %2855 = vmatmul.mubr.bf16.gmra.mxu1 %v3532_v55  ;;  %v3547_v14 = vcombine.high %v437_v61, %v441_v7  ;;  %v3549_v55 = vcombine.high %v438_v1, %v442_v19 }
 0x1ec   : > { %v4455_v53 = vadd.f32 %v2342_v51, %v2053_v43  ;;  %2573 = vmatprep.mubr.bf16.mxu0 %v3539_v45  ;;  %2862 = vmatprep.mubr.bf16.mxu1 %v3541_v30 }
 0x1ed   : > { %v2055_v56 = vpop.f32.mrf.mxu0  ;;  %v2344_v38 = vpop.f32.mrf.mxu1 }
 0x1ee   : > { %4770 = vst [vmem:[#allocation12_spill] sm:$0xff] %v4455_v53  ;;  %v445_v38 = vld [vmem:[%s4009_s15 + $0x4d0] sm:$0xff]  ;;  %v3546_v53 = vcombine.low %v437_v61, %v441_v7 }
 0x1ef   : > { %v2056_v8 = vpop.f32.mrf.mxu0  ;;  %v2345_v22 = vpop.f32.mrf.mxu1 }
 0x1f0   : > { %v4461_v41 = vadd.f32 %v2345_v22, %v2056_v8  ;;  %v450_v22 = vld [vmem:[%s4009_s15 + $0x4f8] sm:$0xff] }
 0x1f1   : > { %v2058_v45 = vpop.f32.mrf.mxu0  ;;  %v2347_v30 = vpop.f32.mrf.mxu1 }
 0x1f2   : > { %4771 = vst [vmem:[#allocation13_spill] sm:$0xff] %v4461_v41  ;;  %v3548_v45 = vcombine.low %v438_v1, %v442_v19  ;;  %v457_v1 = vld [vmem:[%s4009_s15 + $0x530] sm:$0xff]  ;;  %v454_v19 = vld [vmem:[%s4009_s15 + $0x518] sm:$0xff] }
 0x1f3   : > { %v2061_v43 = vpop.f32.mrf.mxu0  ;;  %v2350_v51 = vpop.f32.mrf.mxu1  ;;  %2574 = vmatmul.mubr.bf16.gmra.mxu0 %v3538_v5  ;;  %2863 = vmatmul.mubr.bf16.gmra.mxu1 %v3540_v59  ;;  %v3555_v5 = vcombine.high %v445_v38, %v449_v34  ;;  %v3557_v59 = vcombine.high %v446_v42, %v450_v22 }
 0x1f4   : > { %v4463_v56 = vadd.f32 %v2350_v51, %v2061_v43  ;;  %2581 = vmatprep.mubr.bf16.mxu0 %v3547_v14  ;;  %2870 = vmatprep.mubr.bf16.mxu1 %v3549_v55 }
 0x1f5   : > { %v2063_v26 = vpop.f32.mrf.mxu0  ;;  %v2352_v16 = vpop.f32.mrf.mxu1 }
 0x1f6   : > { %4772 = vst [vmem:[#allocation14_spill] sm:$0xff] %v4463_v56  ;;  %v453_v16 = vld [vmem:[%s4009_s15 + $0x510] sm:$0xff]  ;;  %v3554_v56 = vcombine.low %v445_v38, %v449_v34 }
 0x1f7   : > { %v2064_v8 = vpop.f32.mrf.mxu0  ;;  %v2353_v41 = vpop.f32.mrf.mxu1 }
 0x1f8   : > { %v4469_v30 = vadd.f32 %v2353_v41, %v2064_v8  ;;  %v458_v41 = vld [vmem:[%s4009_s15 + $0x538] sm:$0xff] }
 0x1f9   : > { %v2066_v14 = vpop.f32.mrf.mxu0  ;;  %v2355_v55 = vpop.f32.mrf.mxu1 }
 0x1fa   : > { %4773 = vst [vmem:[#allocation15_spill] sm:$0xff] %v4469_v30  ;;  %v3556_v14 = vcombine.low %v446_v42, %v450_v22  ;;  %v465_v42 = vld [vmem:[%s4009_s15 + $0x570] sm:$0xff]  ;;  %v462_v22 = vld [vmem:[%s4009_s15 + $0x558] sm:$0xff] }
 0x1fb   : > { %v2069_v43 = vpop.f32.mrf.mxu0  ;;  %v2358_v51 = vpop.f32.mrf.mxu1  ;;  %2582 = vmatmul.mubr.bf16.gmra.mxu0 %v3546_v53  ;;  %2871 = vmatmul.mubr.bf16.gmra.mxu1 %v3548_v45  ;;  %v3563_v53 = vcombine.high %v453_v16, %v457_v1  ;;  %v3565_v45 = vcombine.high %v454_v19, %v458_v41 }
 0x1fc   : > { %v4471_v26 = vadd.f32 %v2358_v51, %v2069_v43  ;;  %2589 = vmatprep.mubr.bf16.mxu0 %v3555_v5  ;;  %2878 = vmatprep.mubr.bf16.mxu1 %v3557_v59 }
 0x1fd   : > { %v2071_v61 = vpop.f32.mrf.mxu0  ;;  %v2360_v7 = vpop.f32.mrf.mxu1 }
 0x1fe   : > { %4774 = vst [vmem:[#allocation16_spill] sm:$0xff] %v4471_v26  ;;  %v461_v7 = vld [vmem:[%s4009_s15 + $0x550] sm:$0xff]  ;;  %v3562_v26 = vcombine.low %v453_v16, %v457_v1 }
 0x1ff   : > { %v2072_v8 = vpop.f32.mrf.mxu0  ;;  %v2361_v30 = vpop.f32.mrf.mxu1 }
 0x200   : > { %v4477_v55 = vadd.f32 %v2361_v30, %v2072_v8  ;;  %v466_v30 = vld [vmem:[%s4009_s15 + $0x578] sm:$0xff] }
 0x201   : > { %v2074_v5 = vpop.f32.mrf.mxu0  ;;  %v2363_v59 = vpop.f32.mrf.mxu1 }
 0x202   : > { %4775 = vst [vmem:[#allocation17_spill] sm:$0xff] %v4477_v55  ;;  %v3564_v5 = vcombine.low %v454_v19, %v458_v41  ;;  %v473_v19 = vld [vmem:[%s4009_s15 + $0x5b0] sm:$0xff]  ;;  %v470_v41 = vld [vmem:[%s4009_s15 + $0x598] sm:$0xff] }
 0x203   : > { %v2077_v43 = vpop.f32.mrf.mxu0  ;;  %v2366_v51 = vpop.f32.mrf.mxu1  ;;  %2590 = vmatmul.mubr.bf16.gmra.mxu0 %v3554_v56  ;;  %2879 = vmatmul.mubr.bf16.gmra.mxu1 %v3556_v14  ;;  %v3571_v56 = vcombine.high %v461_v7, %v465_v42  ;;  %v3573_v14 = vcombine.high %v462_v22, %v466_v30 }
 0x204   : > { %v4479_v61 = vadd.f32 %v2366_v51, %v2077_v43  ;;  %2597 = vmatprep.mubr.bf16.mxu0 %v3563_v53  ;;  %2886 = vmatprep.mubr.bf16.mxu1 %v3565_v45 }
 0x205   : > { %v2079_v38 = vpop.f32.mrf.mxu0  ;;  %v2368_v34 = vpop.f32.mrf.mxu1 }
 0x206   : > { %4776 = vst [vmem:[#allocation18_spill] sm:$0xff] %v4479_v61  ;;  %v469_v34 = vld [vmem:[%s4009_s15 + $0x590] sm:$0xff]  ;;  %v3570_v61 = vcombine.low %v461_v7, %v465_v42 }
 0x207   : > { %v2080_v8 = vpop.f32.mrf.mxu0  ;;  %v2369_v55 = vpop.f32.mrf.mxu1 }
 0x208   : > { %v4485_v59 = vadd.f32 %v2369_v55, %v2080_v8  ;;  %v474_v55 = vld [vmem:[%s4009_s15 + $0x5b8] sm:$0xff] }
 0x209   : > { %v2082_v53 = vpop.f32.mrf.mxu0  ;;  %v2371_v45 = vpop.f32.mrf.mxu1 }
 0x20a   : > { %4777 = vst [vmem:[#allocation19_spill] sm:$0xff] %v4485_v59  ;;  %v3572_v53 = vcombine.low %v462_v22, %v466_v30  ;;  %v481_v22 = vld [vmem:[%s4009_s15 + $0x5f0] sm:$0xff]  ;;  %v478_v30 = vld [vmem:[%s4009_s15 + $0x5d8] sm:$0xff] }
 0x20b   : > { %v2085_v43 = vpop.f32.mrf.mxu0  ;;  %v2374_v51 = vpop.f32.mrf.mxu1  ;;  %2598 = vmatmul.mubr.bf16.gmra.mxu0 %v3562_v26  ;;  %2887 = vmatmul.mubr.bf16.gmra.mxu1 %v3564_v5  ;;  %v3579_v26 = vcombine.high %v469_v34, %v473_v19  ;;  %v3581_v5 = vcombine.high %v470_v41, %v474_v55 }
 0x20c   : > { %v4487_v38 = vadd.f32 %v2374_v51, %v2085_v43  ;;  %2605 = vmatprep.mubr.bf16.mxu0 %v3571_v56  ;;  %2894 = vmatprep.mubr.bf16.mxu1 %v3573_v14 }
 0x20d   : > { %v2087_v16 = vpop.f32.mrf.mxu0  ;;  %v2376_v1 = vpop.f32.mrf.mxu1 }
 0x20e   : > { %4778 = vst [vmem:[#allocation20_spill] sm:$0xff] %v4487_v38  ;;  %v477_v1 = vld [vmem:[%s4009_s15 + $0x5d0] sm:$0xff]  ;;  %v3578_v38 = vcombine.low %v469_v34, %v473_v19 }
 0x20f   : > { %v2088_v8 = vpop.f32.mrf.mxu0  ;;  %v2377_v59 = vpop.f32.mrf.mxu1 }
 0x210   : > { %v4493_v45 = vadd.f32 %v2377_v59, %v2088_v8  ;;  %v482_v59 = vld [vmem:[%s4009_s15 + $0x5f8] sm:$0xff] }
 0x211   : > { %v2090_v56 = vpop.f32.mrf.mxu0  ;;  %v2379_v14 = vpop.f32.mrf.mxu1 }
 0x212   : > { %4779 = vst [vmem:[#allocation21_spill] sm:$0xff] %v4493_v45  ;;  %v3580_v56 = vcombine.low %v470_v41, %v474_v55  ;;  %v489_v41 = vld [vmem:[%s4009_s15 + $0x630] sm:$0xff]  ;;  %v486_v55 = vld [vmem:[%s4009_s15 + $0x618] sm:$0xff] }
 0x213   : > { %v2093_v43 = vpop.f32.mrf.mxu0  ;;  %v2382_v51 = vpop.f32.mrf.mxu1  ;;  %2606 = vmatmul.mubr.bf16.gmra.mxu0 %v3570_v61  ;;  %2895 = vmatmul.mubr.bf16.gmra.mxu1 %v3572_v53  ;;  %v3587_v61 = vcombine.high %v477_v1, %v481_v22  ;;  %v3589_v53 = vcombine.high %v478_v30, %v482_v59 }
 0x214   : > { %v4495_v16 = vadd.f32 %v2382_v51, %v2093_v43  ;;  %2613 = vmatprep.mubr.bf16.mxu0 %v3579_v26  ;;  %2902 = vmatprep.mubr.bf16.mxu1 %v3581_v5 }
 0x215   : > { %v2095_v7 = vpop.f32.mrf.mxu0  ;;  %v2384_v42 = vpop.f32.mrf.mxu1 }
 0x216   : > { %4780 = vst [vmem:[#allocation22_spill] sm:$0xff] %v4495_v16  ;;  %v485_v42 = vld [vmem:[%s4009_s15 + $0x610] sm:$0xff]  ;;  %v3586_v16 = vcombine.low %v477_v1, %v481_v22 }
 0x217   : > { %v2096_v8 = vpop.f32.mrf.mxu0  ;;  %v2385_v45 = vpop.f32.mrf.mxu1 }
 0x218   : > { %v4501_v14 = vadd.f32 %v2385_v45, %v2096_v8  ;;  %v490_v45 = vld [vmem:[%s4009_s15 + $0x638] sm:$0xff] }
 0x219   : > { %v2098_v26 = vpop.f32.mrf.mxu0  ;;  %v2387_v5 = vpop.f32.mrf.mxu1 }
 0x21a   : > { %4781 = vst [vmem:[#allocation23_spill] sm:$0xff] %v4501_v14  ;;  %v3588_v26 = vcombine.low %v478_v30, %v482_v59  ;;  %v497_v30 = vld [vmem:[%s4009_s15 + $0x670] sm:$0xff]  ;;  %v494_v59 = vld [vmem:[%s4009_s15 + $0x658] sm:$0xff] }
 0x21b   : > { %v2101_v43 = vpop.f32.mrf.mxu0  ;;  %v2390_v51 = vpop.f32.mrf.mxu1  ;;  %2614 = vmatmul.mubr.bf16.gmra.mxu0 %v3578_v38  ;;  %2903 = vmatmul.mubr.bf16.gmra.mxu1 %v3580_v56  ;;  %v3595_v38 = vcombine.high %v485_v42, %v489_v41  ;;  %v3597_v56 = vcombine.high %v486_v55, %v490_v45 }
 0x21c   : > { %v4503_v7 = vadd.f32 %v2390_v51, %v2101_v43  ;;  %2621 = vmatprep.mubr.bf16.mxu0 %v3587_v61  ;;  %2910 = vmatprep.mubr.bf16.mxu1 %v3589_v53 }
 0x21d   : > { %v2103_v34 = vpop.f32.mrf.mxu0  ;;  %v2392_v19 = vpop.f32.mrf.mxu1 }
 0x21e   : > { %4782 = vst [vmem:[#allocation24_spill] sm:$0xff] %v4503_v7  ;;  %v493_v19 = vld [vmem:[%s4009_s15 + $0x650] sm:$0xff] }
 0x21f   : > { %v2104_v8 = vpop.f32.mrf.mxu0  ;;  %v2393_v14 = vpop.f32.mrf.mxu1 }
 0x220   : > { %v4509_v5 = vadd.f32 %v2393_v14, %v2104_v8  ;;  %v498_v14 = vld [vmem:[%s4009_s15 + $0x678] sm:$0xff] }
 0x221   : > { %v2106_v61 = vpop.f32.mrf.mxu0  ;;  %v2395_v53 = vpop.f32.mrf.mxu1 }
 0x222   : > { %4783 = vst [vmem:[#allocation25_spill] sm:$0xff] %v4509_v5  ;;  %v3594_v61 = vcombine.low %v485_v42, %v489_v41  ;;  %v3596_v53 = vcombine.low %v486_v55, %v490_v45  ;;  %v505_v55 = vld [vmem:[%s4009_s15 + $0x6b0] sm:$0xff]  ;;  %v502_v45 = vld [vmem:[%s4009_s15 + $0x698] sm:$0xff] }
 0x223   : > { %v2109_v43 = vpop.f32.mrf.mxu0  ;;  %v2398_v51 = vpop.f32.mrf.mxu1  ;;  %2622 = vmatmul.mubr.bf16.gmra.mxu0 %v3586_v16  ;;  %2911 = vmatmul.mubr.bf16.gmra.mxu1 %v3588_v26  ;;  %v3603_v16 = vcombine.high %v493_v19, %v497_v30  ;;  %v3605_v26 = vcombine.high %v494_v59, %v498_v14 }
 0x224   : > { %v4511_v34 = vadd.f32 %v2398_v51, %v2109_v43  ;;  %2629 = vmatprep.mubr.bf16.mxu0 %v3595_v38  ;;  %2918 = vmatprep.mubr.bf16.mxu1 %v3597_v56 }
 0x225   : > { %v2111_v1 = vpop.f32.mrf.mxu0  ;;  %v2400_v22 = vpop.f32.mrf.mxu1 }
 0x226   : > { %4784 = vst [vmem:[#allocation26_spill] sm:$0xff] %v4511_v34  ;;  %v501_v22 = vld [vmem:[%s4009_s15 + $0x690] sm:$0xff] }
 0x227   : > { %v2112_v8 = vpop.f32.mrf.mxu0  ;;  %v2401_v5 = vpop.f32.mrf.mxu1 }
 0x228   : > { %v4517_v7 = vadd.f32 %v2401_v5, %v2112_v8  ;;  %v506_v5 = vld [vmem:[%s4009_s15 + $0x6b8] sm:$0xff] }
 0x229   : > { %v2114_v38 = vpop.f32.mrf.mxu0  ;;  %v2403_v56 = vpop.f32.mrf.mxu1 }
 0x22a   : > { %4785 = vst [vmem:[#allocation27_spill] sm:$0xff] %v4517_v7  ;;  %v3602_v38 = vcombine.low %v493_v19, %v497_v30  ;;  %v3604_v56 = vcombine.low %v494_v59, %v498_v14  ;;  %v509_v30 = vld [vmem:[%s4009_s15 + $0x6d0] sm:$0xff]  ;;  %v510_v14 = vld [vmem:[%s4009_s15 + $0x6d8] sm:$0xff] }
 0x22b   : > { %v2439_v43 = vpop.f32.mrf.mxu0  ;;  %2630 = vmatmul.mubr.bf16.gmra.mxu0 %v3594_v61  ;;  %v2728_v51 = vpop.f32.mrf.mxu1  ;;  %2919 = vmatmul.mubr.bf16.gmra.mxu1 %v3596_v53  ;;  %v3613_v53 = vcombine.high %v502_v45, %v506_v5  ;;  %v513_v59 = vld [vmem:[%s4009_s15 + $0x6f0] sm:$0xff] }
 0x22c   : > { %v2440_v1 = vadd.f32 %v2439_v43, %v4263_v20  ;;  %2637 = vmatprep.mubr.bf16.mxu0 %v3603_v16  ;;  %2926 = vmatprep.mubr.bf16.mxu1 %v3605_v26  ;;  %v3611_v20 = vcombine.high %v501_v22, %v505_v55 }
 0x22d   : > { %v2441_v42 = vpop.f32.mrf.mxu0  ;;  %v2730_v41 = vpop.f32.mrf.mxu1 }
 0x22e   : > { %v2729_v8 = vadd.f32 %v2728_v51, %v2440_v1  ;;  %v514_v1 = vld [vmem:[%s4009_s15 + $0x6f8] sm:$0xff] }
 0x22f   : > { %v2442_v7 = vpop.f32.mrf.mxu0  ;;  %v2731_v34 = vpop.f32.mrf.mxu1 }
 0x230   : > { %3717 = vrsqrt.f32 %v2729_v8  ;;  %v2443_v61 = vadd.f32 %v2442_v7, %v4269_v29 }
 0x231   : > { %v2444_v16 = vpop.f32.mrf.mxu0  ;;  %v2733_v26 = vpop.f32.mrf.mxu1 }
 0x232   : > { %v2732_v43 = vadd.f32 %v2731_v34, %v2443_v61  ;;  %v3610_v34 = vcombine.low %v501_v22, %v505_v55  ;;  %v3612_v61 = vcombine.low %v502_v45, %v506_v5  ;;  %v517_v45 = vld [vmem:[%s4009_s15 + $0x710] sm:$0xff] }
 0x233   : > { %v2447_v42 = vpop.f32.mrf.mxu0  ;;  %2638 = vmatmul.mubr.bf16.gmra.mxu0 %v3602_v38  ;;  %v2736_v51 = vpop.f32.mrf.mxu1  ;;  %2927 = vmatmul.mubr.bf16.gmra.mxu1 %v3604_v56  ;;  %v3619_v56 = vcombine.high %v509_v30, %v513_v59 }
 0x234   : > { %3719 = vrsqrt.f32 %v2732_v43  ;;  %v2448_v19 = vadd.f32 %v2447_v42, %v4271_v36  ;;  %2645 = vmatprep.mubr.bf16.mxu0 %v3611_v20  ;;  %2934 = vmatprep.mubr.bf16.mxu1 %v3613_v53  ;;  %v3621_v36 = vcombine.high %v510_v14, %v514_v1 }
 0x235   : > { %v2449_v29 = vpop.f32.mrf.mxu0  ;;  %v2738_v7 = vpop.f32.mrf.mxu1 }
 0x236   : > { %v2737_v41 = vadd.f32 %v2736_v51, %v2448_v19  ;;  %v521_v51 = vld [vmem:[%s4009_s15 + $0x730] sm:$0xff]  ;;  %v518_v19 = vld [vmem:[%s4009_s15 + $0x718] sm:$0xff] }
 0x237   : > { %v2450_v8 = vpop.f32.mrf.mxu0  ;;  %v2739_v16 = vpop.f32.mrf.mxu1  ;;  %v522_v29 = vld [vmem:[%s4009_s15 + $0x738] sm:$0xff] }
 0x238   : > { %3721 = vrsqrt.f32 %v2737_v41  ;;  %v2451_v38 = vadd.f32 %v2450_v8, %v4277_v47 }
 0x239   : > { %v2452_v20 = vpop.f32.mrf.mxu0  ;;  %v2741_v53 = vpop.f32.mrf.mxu1 }
 0x23a   : > { %v2740_v26 = vadd.f32 %v2739_v16, %v2451_v38  ;;  %v3618_v16 = vcombine.low %v509_v30, %v513_v59  ;;  %v3629_v38 = vcombine.high %v518_v19, %v522_v29  ;;  %v525_v59 = vld [vmem:[%s4009_s15 + $0x750] sm:$0xff] }
 0x23b   : > { %v2455_v22 = vpop.f32.mrf.mxu0  ;;  %2646 = vmatmul.mubr.bf16.gmra.mxu0 %v3610_v34  ;;  %v2744_v55 = vpop.f32.mrf.mxu1  ;;  %2935 = vmatmul.mubr.bf16.gmra.mxu1 %v3612_v61  ;;  %v3620_v34 = vcombine.low %v510_v14, %v514_v1  ;;  %v3627_v61 = vcombine.high %v517_v45, %v521_v51 }
 0x23c   : > { %3723 = vrsqrt.f32 %v2740_v26  ;;  %v2456_v47 = vadd.f32 %v2455_v22, %v4279_v54  ;;  %2653 = vmatprep.mubr.bf16.mxu0 %v3619_v56  ;;  %2942 = vmatprep.mubr.bf16.mxu1 %v3621_v36 }
 0x23d   : > { %v3718_v5 = vpop.eup %3717  ;;  %v2457_v43 = vpop.f32.mrf.mxu0 }
 0x23e   : > { %v2746_v42 = vpop.f32.mrf.mxu1  ;;  %3243 = vst.msk [vmem:[%s4535_s20] sm:$0xff] %vm3242_vm0, %v3718_v5  ;;  %v2745_v7 = vadd.f32 %v2744_v55, %v2456_v47  ;;  %v529_v55 = vld [vmem:[%s4009_s15 + $0x770] sm:$0xff]  ;;  %v526_v47 = vld [vmem:[%s4009_s15 + $0x758] sm:$0xff] }
 0x23f   : > { %v2458_v41 = vpop.f32.mrf.mxu0  ;;  %v530_v5 = vld [vmem:[%s4009_s15 + $0x778] sm:$0xff] }
 0x240   : > { %v2747_v8 = vpop.f32.mrf.mxu1  ;;  %3725 = vrsqrt.f32 %v2745_v7  ;;  %v2459_v54 = vadd.f32 %v2458_v41, %v4285_v3  ;;  %v3626_v41 = vcombine.low %v517_v45, %v521_v51  ;;  %v533_v51 = vld [vmem:[%s4009_s15 + $0x790] sm:$0xff] }
 0x241   : > { %v3720_v56 = vpop.eup %3719  ;;  %v2460_v36 = vpop.f32.mrf.mxu0 }
 0x242   : > { %v2749_v20 = vpop.f32.mrf.mxu1  ;;  %3244 = vst.msk [vmem:[%s4535_s20 + $0x8] sm:$0xff] %vm3242_vm0, %v3720_v56  ;;  %v2748_v53 = vadd.f32 %v2747_v8, %v2459_v54  ;;  %v3628_v8 = vcombine.low %v518_v19, %v522_v29 }
 0x243   : > { %v2463_v26 = vpop.f32.mrf.mxu0  ;;  %2654 = vmatmul.mubr.bf16.gmra.mxu0 %v3618_v16  ;;  %2943 = vmatmul.mubr.bf16.gmra.mxu1 %v3620_v34  ;;  %v3635_v16 = vcombine.high %v525_v59, %v529_v55  ;;  %v3637_v34 = vcombine.high %v526_v47, %v530_v5 }
 0x244   : > { %v2752_v30 = vpop.f32.mrf.mxu1  ;;  %3727 = vrsqrt.f32 %v2748_v53  ;;  %v2464_v3 = vadd.f32 %v2463_v26, %v4287_v10  ;;  %2661 = vmatprep.mubr.bf16.mxu0 %v3627_v61  ;;  %2950 = vmatprep.mubr.bf16.mxu1 %v3629_v38  ;;  %v537_v53 = vld [vmem:[%s4009_s15 + $0x7b0] sm:$0xff]  ;;  %v534_v26 = vld [vmem:[%s4009_s15 + $0x798] sm:$0xff] }
 0x245   : > { %v3722_v14 = vpop.eup %3721  ;;  %v2465_v1 = vpop.f32.mrf.mxu0 }
 0x246   : > { %v2754_v22 = vpop.f32.mrf.mxu1  ;;  %3245 = vst.msk [vmem:[%s4535_s20 + $0x10] sm:$0xff] %vm3242_vm0, %v3722_v14  ;;  %v2753_v43 = vadd.f32 %v2752_v30, %v2464_v3  ;;  %v538_v30 = vld [vmem:[%s4009_s15 + $0x7b8] sm:$0xff] }
 0x247   : > { %v2466_v42 = vpop.f32.mrf.mxu0  ;;  %v3634_v22 = vcombine.low %v525_v59, %v529_v55  ;;  %v541_v55 = vld [vmem:[%s4009_s15 + $0x7d0] sm:$0xff] }
 0x248   : > { %v2755_v7 = vpop.f32.mrf.mxu1  ;;  %3729 = vrsqrt.f32 %v2753_v43  ;;  %v2467_v10 = vadd.f32 %v2466_v42, %v4293_v21  ;;  %v3636_v43 = vcombine.low %v526_v47, %v530_v5  ;;  %v3643_v42 = vcombine.high %v533_v51, %v537_v53 }
 0x249   : > { %v3724_v54 = vpop.eup %3723  ;;  %v2468_v61 = vpop.f32.mrf.mxu0 }
 0x24a   : > { %v2757_v38 = vpop.f32.mrf.mxu1  ;;  %3246 = vst.msk [vmem:[%s4535_s20 + $0x18] sm:$0xff] %vm3242_vm0, %v3724_v54  ;;  %v2756_v56 = vadd.f32 %v2755_v7, %v2467_v10  ;;  %v3645_v7 = vcombine.high %v534_v26, %v538_v30  ;;  %v545_v61 = vld [vmem:[%s4009_s15 + $0x7f0] sm:$0xff] }
 0x24b   : > { %v2471_v36 = vpop.f32.mrf.mxu0  ;;  %2662 = vmatmul.mubr.bf16.gmra.mxu0 %v3626_v41  ;;  %2951 = vmatmul.mubr.bf16.gmra.mxu1 %v3628_v8  ;;  %v542_v38 = vld [vmem:[%s4009_s15 + $0x7d8] sm:$0xff] }
 0x24c   : > { %v2760_v45 = vpop.f32.mrf.mxu1  ;;  %3731 = vrsqrt.f32 %v2756_v56  ;;  %v2472_v21 = vadd.f32 %v2471_v36, %v4295_v27  ;;  %2669 = vmatprep.mubr.bf16.mxu0 %v3635_v16  ;;  %2958 = vmatprep.mubr.bf16.mxu1 %v3637_v34  ;;  %v546_v56 = vld [vmem:[%s4009_s15 + $0x7f8] sm:$0xff] }
 0x24d   : > { %v3726_v19 = vpop.eup %3725  ;;  %v2473_v29 = vpop.f32.mrf.mxu0 }
 0x24e   : > { %v2762_v20 = vpop.f32.mrf.mxu1  ;;  %3247 = vst.msk [vmem:[%s4535_s20 + $0x20] sm:$0xff] %vm3242_vm0, %v3726_v19  ;;  %v2761_v3 = vadd.f32 %v2760_v45, %v2472_v21  ;;  %v3642_v19 = vcombine.low %v533_v51, %v537_v53  ;;  %v3644_v29 = vcombine.low %v534_v26, %v538_v30 }
 0x24f   : > { %v2474_v14 = vpop.f32.mrf.mxu0  ;;  %v3651_v20 = vcombine.high %v541_v55, %v545_v61 }
 0x250   : > { %v2763_v1 = vpop.f32.mrf.mxu1  ;;  %3733 = vrsqrt.f32 %v2761_v3  ;;  %v2475_v27 = vadd.f32 %v2474_v14, %v4301_v40  ;;  %v3653_v3 = vcombine.high %v542_v38, %v546_v56 }
 0x251   : > { %v3728_v41 = vpop.eup %3727  ;;  %v2476_v8 = vpop.f32.mrf.mxu0 }
 0x252   : > { %v2765_v10 = vpop.f32.mrf.mxu1  ;;  %3248 = vst.msk [vmem:[%s4535_s20 + $0x28] sm:$0xff] %vm3242_vm0, %v3728_v41  ;;  %v2764_v16 = vadd.f32 %v2763_v1, %v2475_v27  ;;  %v3650_v8 = vcombine.low %v541_v55, %v545_v61 }
 0x253   : > { %v2479_v34 = vpop.f32.mrf.mxu0  ;;  %2670 = vmatmul.mubr.bf16.gmra.mxu0 %v3634_v22  ;;  %2959 = vmatmul.mubr.bf16.gmra.mxu1 %v3636_v43  ;;  %v3652_v10 = vcombine.low %v542_v38, %v546_v56 }
 0x254   : > { %v2768_v59 = vpop.f32.mrf.mxu1  ;;  %3735 = vrsqrt.f32 %v2764_v16  ;;  %v2480_v40 = vadd.f32 %v2479_v34, %v4303_v48  ;;  %2677 = vmatprep.mubr.bf16.mxu0 %v3643_v42  ;;  %2966 = vmatprep.mubr.bf16.mxu1 %v3645_v7 }
 0x255   : > { %v3730_v47 = vpop.eup %3729  ;;  %v2481_v5 = vpop.f32.mrf.mxu0 }
 0x256   : > { %v2770_v54 = vpop.f32.mrf.mxu1  ;;  %3249 = vst.msk [vmem:[%s4535_s20 + $0x30] sm:$0xff] %vm3242_vm0, %v3730_v47  ;;  %v2769_v36 = vadd.f32 %v2768_v59, %v2480_v40 }
 0x257   : > { %v2482_v45 = vpop.f32.mrf.mxu0 }
 0x258   : > { %v2771_v21 = vpop.f32.mrf.mxu1  ;;  %3737 = vrsqrt.f32 %v2769_v36  ;;  %v2483_v48 = vadd.f32 %v2482_v45, %v4309_v60 }
 0x259   : > { %v3732_v14 = vpop.eup %3731  ;;  %v2484_v1 = vpop.f32.mrf.mxu0 }
 0x25a   : > { %v2773_v22 = vpop.f32.mrf.mxu1  ;;  %3250 = vst.msk [vmem:[%s4535_s20 + $0x38] sm:$0xff] %vm3242_vm0, %v3732_v14  ;;  %v2772_v43 = vadd.f32 %v2771_v21, %v2483_v48 }
 0x25b   : > { %v2487_v27 = vpop.f32.mrf.mxu0  ;;  %2678 = vmatmul.mubr.bf16.gmra.mxu0 %v3642_v19  ;;  %2967 = vmatmul.mubr.bf16.gmra.mxu1 %v3644_v29 }
 0x25c   : > { %v2776_v42 = vpop.f32.mrf.mxu1  ;;  %3739 = vrsqrt.f32 %v2772_v43  ;;  %v2488_v51 = vadd.f32 %v2487_v27, %v4311_v6  ;;  %2685 = vmatprep.mubr.bf16.mxu0 %v3651_v20  ;;  %2974 = vmatprep.mubr.bf16.mxu1 %v3653_v3 }
 0x25d   : > { %v3734_v60 = vpop.eup %3733  ;;  %v2489_v53 = vpop.f32.mrf.mxu0 }
 0x25e   : > { %v2778_v26 = vpop.f32.mrf.mxu1  ;;  %3251 = vst.msk [vmem:[%s4535_s20 + $0x40] sm:$0xff] %vm3242_vm0, %v3734_v60  ;;  %v2777_v30 = vadd.f32 %v2776_v42, %v2488_v51 }
 0x25f   : > { %v2490_v7 = vpop.f32.mrf.mxu0 }
 0x260   : > { %v2779_v41 = vpop.f32.mrf.mxu1  ;;  %3741 = vrsqrt.f32 %v2777_v30  ;;  %v2491_v16 = vadd.f32 %v2490_v7, %v4317_v18 }
 0x261   : > { %v3736_v34 = vpop.eup %3735  ;;  %v2492_v59 = vpop.f32.mrf.mxu0 }
 0x262   : > { %v2781_v6 = vpop.f32.mrf.mxu1  ;;  %3252 = vst.msk [vmem:[%s4535_s20 + $0x48] sm:$0xff] %vm3242_vm0, %v3736_v34  ;;  %v2780_v40 = vadd.f32 %v2779_v41, %v2491_v16 }
 0x263   : > { %v2495_v47 = vpop.f32.mrf.mxu0  ;;  %2686 = vmatmul.mubr.bf16.gmra.mxu0 %v3650_v8  ;;  %2975 = vmatmul.mubr.bf16.gmra.mxu1 %v3652_v10 }
 0x264   : > { %v2784_v5 = vpop.f32.mrf.mxu1  ;;  %3743 = vrsqrt.f32 %v2780_v40  ;;  %v2496_v54 = vadd.f32 %v2495_v47, %v4319_v25 }
 0x265   : > { %v3738_v55 = vpop.eup %3737  ;;  %v2497_v61 = vpop.f32.mrf.mxu0 }
 0x266   : > { %v2786_v38 = vpop.f32.mrf.mxu1  ;;  %3253 = vst.msk [vmem:[%s4535_s20 + $0x50] sm:$0xff] %vm3242_vm0, %v3738_v55  ;;  %v2785_v18 = vadd.f32 %v2784_v5, %v2496_v54 }
 0x267   : > { %v2498_v56 = vpop.f32.mrf.mxu0 }
 0x268   : > { %v2787_v36 = vpop.f32.mrf.mxu1  ;;  %3745 = vrsqrt.f32 %v2785_v18  ;;  %v2499_v45 = vadd.f32 %v2498_v56, %v4325_v39 }
 0x269   : > { %v3740_v21 = vpop.eup %3739  ;;  %v2500_v19 = vpop.f32.mrf.mxu0 }
 0x26a   : > { %v2789_v29 = vpop.f32.mrf.mxu1  ;;  %3254 = vst.msk [vmem:[%s4535_s20 + $0x58] sm:$0xff] %vm3242_vm0, %v3740_v21  ;;  %v2788_v48 = vadd.f32 %v2787_v36, %v2499_v45 }
 0x26b   : > { %v2503_v20 = vpop.f32.mrf.mxu0 }
 0x26c   : > { %v2792_v25 = vpop.f32.mrf.mxu1  ;;  %3747 = vrsqrt.f32 %v2788_v48  ;;  %v2504_v3 = vadd.f32 %v2503_v20, %v4327_v49 }
 0x26d   : > { %v3742_v14 = vpop.eup %3741  ;;  %v2505_v1 = vpop.f32.mrf.mxu0 }
 0x26e   : > { %v2794_v22 = vpop.f32.mrf.mxu1  ;;  %3255 = vst.msk [vmem:[%s4535_s20 + $0x60] sm:$0xff] %vm3242_vm0, %v3742_v14  ;;  %v2793_v43 = vadd.f32 %v2792_v25, %v2504_v3 }
 0x26f   : > { %v2506_v27 = vpop.f32.mrf.mxu0 }
 0x270   : > { %v2795_v39 = vpop.f32.mrf.mxu1  ;;  %3749 = vrsqrt.f32 %v2793_v43  ;;  %v2507_v42 = vadd.f32 %v2506_v27, %v4333_v62 }
 0x271   : > { %v3744_v51 = vpop.eup %3743  ;;  %v2508_v60 = vpop.f32.mrf.mxu0 }
 0x272   : > { %v2797_v53 = vpop.f32.mrf.mxu1  ;;  %3256 = vst.msk [vmem:[%s4535_s20 + $0x68] sm:$0xff] %vm3242_vm0, %v3744_v51  ;;  %v2796_v26 = vadd.f32 %v2795_v39, %v2507_v42 }
 0x273   : > { %v2511_v30 = vpop.f32.mrf.mxu0 }
 0x274   : > { %v2800_v49 = vpop.f32.mrf.mxu1  ;;  %3751 = vrsqrt.f32 %v2796_v26  ;;  %v2512_v7 = vadd.f32 %v2511_v30, %v4335_v9 }
 0x275   : > { %v3746_v41 = vpop.eup %3745  ;;  %v2513_v8 = vpop.f32.mrf.mxu0 }
 0x276   : > { %v2802_v10 = vpop.f32.mrf.mxu1  ;;  %3257 = vst.msk [vmem:[%s4535_s20 + $0x70] sm:$0xff] %vm3242_vm0, %v3746_v41  ;;  %v2801_v16 = vadd.f32 %v2800_v49, %v2512_v7 }
 0x277   : > { %v2514_v34 = vpop.f32.mrf.mxu0 }
 0x278   : > { %v2803_v62 = vpop.f32.mrf.mxu1  ;;  %3753 = vrsqrt.f32 %v2801_v16  ;;  %v2515_v59 = vadd.f32 %v2514_v34, %v4341_v23 }
 0x279   : > { %v3748_v6 = vpop.eup %3747  ;;  %v2516_v40 = vpop.f32.mrf.mxu0 }
 0x27a   : > { %v2805_v47 = vpop.f32.mrf.mxu1  ;;  %3258 = vst.msk [vmem:[%s4535_s20 + $0x78] sm:$0xff] %vm3242_vm0, %v3748_v6  ;;  %v2804_v5 = vadd.f32 %v2803_v62, %v2515_v59 }
 0x27b   : > { %v2519_v54 = vpop.f32.mrf.mxu0 }
 0x27c   : > { %v2808_v9 = vpop.f32.mrf.mxu1  ;;  %3755 = vrsqrt.f32 %v2804_v5  ;;  %v2520_v55 = vadd.f32 %v2519_v54, %v4343_v32 }
 0x27d   : > { %v3750_v61 = vpop.eup %3749  ;;  %v2521_v38 = vpop.f32.mrf.mxu0 }
 0x27e   : > { %v2810_v18 = vpop.f32.mrf.mxu1  ;;  %3259 = vst.msk [vmem:[%s4535_s20 + $0x80] sm:$0xff] %vm3242_vm0, %v3750_v61  ;;  %v2809_v56 = vadd.f32 %v2808_v9, %v2520_v55 }
 0x27f   : > { %v2522_v36 = vpop.f32.mrf.mxu0 }
 0x280   : > { %v2811_v23 = vpop.f32.mrf.mxu1  ;;  %3757 = vrsqrt.f32 %v2809_v56  ;;  %v2523_v45 = vadd.f32 %v2522_v36, %v4349_v46 }
 0x281   : > { %v3752_v21 = vpop.eup %3751  ;;  %v2524_v19 = vpop.f32.mrf.mxu0 }
 0x282   : > { %v2813_v29 = vpop.f32.mrf.mxu1  ;;  %3260 = vst.msk [vmem:[%s4535_s20 + $0x88] sm:$0xff] %vm3242_vm0, %v3752_v21  ;;  %v2812_v48 = vadd.f32 %v2811_v23, %v2523_v45 }
 0x283   : > { %v2527_v20 = vpop.f32.mrf.mxu0 }
 0x284   : > { %v2816_v32 = vpop.f32.mrf.mxu1  ;;  %3759 = vrsqrt.f32 %v2812_v48  ;;  %v2528_v25 = vadd.f32 %v2527_v20, %v4351_v57 }
 0x285   : > { %v3754_v3 = vpop.eup %3753  ;;  %v2529_v14 = vpop.f32.mrf.mxu0 }
 0x286   : > { %v2818_v1 = vpop.f32.mrf.mxu1  ;;  %3261 = vst.msk [vmem:[%s4535_s20 + $0x90] sm:$0xff] %vm3242_vm0, %v3754_v3  ;;  %v2817_v22 = vadd.f32 %v2816_v32, %v2528_v25 }
 0x287   : > { %v2530_v43 = vpop.f32.mrf.mxu0 }
 0x288   : > { %v2819_v46 = vpop.f32.mrf.mxu1  ;;  %3761 = vrsqrt.f32 %v2817_v22  ;;  %v2531_v27 = vadd.f32 %v2530_v43, %v4357_v12 }
 0x289   : > { %v3756_v39 = vpop.eup %3755  ;;  %v2532_v42 = vpop.f32.mrf.mxu0 }
 0x28a   : > { %v2821_v51 = vpop.f32.mrf.mxu1  ;;  %3262 = vst.msk [vmem:[%s4535_s20 + $0x98] sm:$0xff] %vm3242_vm0, %v3756_v39  ;;  %v2820_v60 = vadd.f32 %v2819_v46, %v2531_v27 }
 0x28b   : > { %v2535_v53 = vpop.f32.mrf.mxu0 }
 0x28c   : > { %v2824_v57 = vpop.f32.mrf.mxu1  ;;  %3763 = vrsqrt.f32 %v2820_v60  ;;  %v2536_v26 = vadd.f32 %v2535_v53, %v4359_v0 }
 0x28d   : > { %v3758_v30 = vpop.eup %3757  ;;  %v2537_v49 = vpop.f32.mrf.mxu0 }
 0x28e   : > { %v2826_v7 = vpop.f32.mrf.mxu1  ;;  %3263 = vst.msk [vmem:[%s4535_s20 + $0xa0] sm:$0xff] %vm3242_vm0, %v3758_v30  ;;  %v2825_v41 = vadd.f32 %v2824_v57, %v2536_v26 }
 0x28f   : > { %v2538_v8 = vpop.f32.mrf.mxu0 }
 0x290   : > { %v2827_v12 = vpop.f32.mrf.mxu1  ;;  %3765 = vrsqrt.f32 %v2825_v41  ;;  %v2539_v10 = vadd.f32 %v2538_v8, %v4365_v37 }
 0x291   : > { %v3760_v16 = vpop.eup %3759  ;;  %v2540_v34 = vpop.f32.mrf.mxu0 }
 0x292   : > { %v2829_v62 = vpop.f32.mrf.mxu1  ;;  %3264 = vst.msk [vmem:[%s4535_s20 + $0xa8] sm:$0xff] %vm3242_vm0, %v3760_v16  ;;  %v2828_v59 = vadd.f32 %v2827_v12, %v2539_v10 }
 0x293   : > { %v2543_v6 = vpop.f32.mrf.mxu0 }
 0x294   : > { %v2832_v0 = vpop.f32.mrf.mxu1  ;;  %3767 = vrsqrt.f32 %v2828_v59  ;;  %v2544_v40 = vadd.f32 %v2543_v6, %v4367_v50 }
 0x295   : > { %v3762_v47 = vpop.eup %3761  ;;  %v2545_v5 = vpop.f32.mrf.mxu0 }
 0x296   : > { %v2834_v54 = vpop.f32.mrf.mxu1  ;;  %3265 = vst.msk [vmem:[%s4535_s20 + $0xb0] sm:$0xff] %vm3242_vm0, %v3762_v47  ;;  %v2833_v9 = vadd.f32 %v2832_v0, %v2544_v40 }
 0x297   : > { %v2546_v55 = vpop.f32.mrf.mxu0 }
 0x298   : > { %v2835_v37 = vpop.f32.mrf.mxu1  ;;  %3769 = vrsqrt.f32 %v2833_v9  ;;  %v2547_v61 = vadd.f32 %v2546_v55, %v4373_v4 }
 0x299   : > { %v3764_v38 = vpop.eup %3763  ;;  %v2548_v18 = vpop.f32.mrf.mxu0 }
 0x29a   : > { %v2837_v56 = vpop.f32.mrf.mxu1  ;;  %3266 = vst.msk [vmem:[%s4535_s20 + $0xb8] sm:$0xff] %vm3242_vm0, %v3764_v38  ;;  %v2836_v36 = vadd.f32 %v2835_v37, %v2547_v61 }
 0x29b   : > { %v2551_v23 = vpop.f32.mrf.mxu0 }
 0x29c   : > { %v2840_v50 = vpop.f32.mrf.mxu1  ;;  %3771 = vrsqrt.f32 %v2836_v36  ;;  %v2552_v45 = vadd.f32 %v2551_v23, %v4375_v15 }
 0x29d   : > { %v3766_v21 = vpop.eup %3765  ;;  %v2553_v19 = vpop.f32.mrf.mxu0 }
 0x29e   : > { %v2842_v29 = vpop.f32.mrf.mxu1  ;;  %3267 = vst.msk [vmem:[%s4535_s20 + $0xc0] sm:$0xff] %vm3242_vm0, %v3766_v21  ;;  %v2841_v48 = vadd.f32 %v2840_v50, %v2552_v45 }
 0x29f   : > { %v2554_v20 = vpop.f32.mrf.mxu0 }
 0x2a0   : > { %v2843_v4 = vpop.f32.mrf.mxu1  ;;  %3773 = vrsqrt.f32 %v2841_v48  ;;  %v2555_v32 = vadd.f32 %v2554_v20, %v4381_v33 }
 0x2a1   : > { %v3768_v25 = vpop.eup %3767  ;;  %v2556_v3 = vpop.f32.mrf.mxu0 }
 0x2a2   : > { %v2845_v14 = vpop.f32.mrf.mxu1  ;;  %3268 = vst.msk [vmem:[%s4535_s20 + $0xc8] sm:$0xff] %vm3242_vm0, %v3768_v25  ;;  %v2844_v1 = vadd.f32 %v2843_v4, %v2555_v32 }
 0x2a3   : > { %v2559_v22 = vpop.f32.mrf.mxu0 }
 0x2a4   : > { %v2848_v15 = vpop.f32.mrf.mxu1  ;;  %3775 = vrsqrt.f32 %v2844_v1  ;;  %v2560_v43 = vadd.f32 %v2559_v22, %v4383_v44 }
 0x2a5   : > { %v3770_v46 = vpop.eup %3769  ;;  %v2561_v27 = vpop.f32.mrf.mxu0 }
 0x2a6   : > { %v2850_v39 = vpop.f32.mrf.mxu1  ;;  %3269 = vst.msk [vmem:[%s4535_s20 + $0xd0] sm:$0xff] %vm3242_vm0, %v3770_v46  ;;  %v2849_v42 = vadd.f32 %v2848_v15, %v2560_v43 }
 0x2a7   : > { %v2562_v51 = vpop.f32.mrf.mxu0 }
 0x2a8   : > { %v2851_v33 = vpop.f32.mrf.mxu1  ;;  %3777 = vrsqrt.f32 %v2849_v42  ;;  %v2563_v60 = vadd.f32 %v2562_v51, %v4389_v2 }
 0x2a9   : > { %v3772_v53 = vpop.eup %3771  ;;  %v2564_v57 = vpop.f32.mrf.mxu0 }
 0x2aa   : > { %v2853_v26 = vpop.f32.mrf.mxu1  ;;  %3270 = vst.msk [vmem:[%s4535_s20 + $0xd8] sm:$0xff] %vm3242_vm0, %v3772_v53  ;;  %v2852_v30 = vadd.f32 %v2851_v33, %v2563_v60 }
 0x2ab   : > { %v2567_v49 = vpop.f32.mrf.mxu0 }
 0x2ac   : > { %v2856_v44 = vpop.f32.mrf.mxu1  ;;  %3779 = vrsqrt.f32 %v2852_v30  ;;  %v2568_v7 = vadd.f32 %v2567_v49, %v4391_v17 }
 0x2ad   : > { %v3774_v41 = vpop.eup %3773  ;;  %v2569_v8 = vpop.f32.mrf.mxu0 }
 0x2ae   : > { %v2858_v12 = vpop.f32.mrf.mxu1  ;;  %3271 = vst.msk [vmem:[%s4535_s20 + $0xe0] sm:$0xff] %vm3242_vm0, %v3774_v41  ;;  %v2857_v10 = vadd.f32 %v2856_v44, %v2568_v7 }
 0x2af   : > { %v2570_v16 = vpop.f32.mrf.mxu0 }
 0x2b0   : > { %v2859_v2 = vpop.f32.mrf.mxu1  ;;  %3781 = vrsqrt.f32 %v2857_v10  ;;  %v2571_v34 = vadd.f32 %v2570_v16, %v4397_v35 }
 0x2b1   : > { %v3776_v62 = vpop.eup %3775  ;;  %v2572_v59 = vpop.f32.mrf.mxu0 }
 0x2b2   : > { %v2861_v6 = vpop.f32.mrf.mxu1  ;;  %3272 = vst.msk [vmem:[%s4535_s20 + $0xe8] sm:$0xff] %vm3242_vm0, %v3776_v62  ;;  %v2860_v0 = vadd.f32 %v2859_v2, %v2571_v34  ;;  %v4786_v34 = vld [vmem:[#allocation6_spill] sm:$0xff] }
 0x2b3   : > { %v2575_v40 = vpop.f32.mrf.mxu0 }
 0x2b4   : > { %v2864_v17 = vpop.f32.mrf.mxu1  ;;  %3783 = vrsqrt.f32 %v2860_v0  ;;  %v2576_v47 = vadd.f32 %v2575_v40, %v4399_v58 }
 0x2b5   : > { %v3778_v5 = vpop.eup %3777  ;;  %v2577_v54 = vpop.f32.mrf.mxu0 }
 0x2b6   : > { %v2866_v9 = vpop.f32.mrf.mxu1  ;;  %3273 = vst.msk [vmem:[%s4535_s20 + $0xf0] sm:$0xff] %vm3242_vm0, %v3778_v5  ;;  %v2865_v55 = vadd.f32 %v2864_v17, %v2576_v47  ;;  %v4787_v47 = vld [vmem:[#allocation7_spill] sm:$0xff] }
 0x2b7   : > { %v2578_v37 = vpop.f32.mrf.mxu0 }
 0x2b8   : > { %v2867_v35 = vpop.f32.mrf.mxu1  ;;  %3785 = vrsqrt.f32 %v2865_v55  ;;  %v2579_v61 = vadd.f32 %v2578_v37, %v4405_v11 }
 0x2b9   : > { %v3780_v38 = vpop.eup %3779  ;;  %v2580_v18 = vpop.f32.mrf.mxu0 }
 0x2ba   : > { %v2869_v56 = vpop.f32.mrf.mxu1  ;;  %3274 = vst.msk [vmem:[%s4535_s20 + $0xf8] sm:$0xff] %vm3242_vm0, %v3780_v38  ;;  %v2868_v36 = vadd.f32 %v2867_v35, %v2579_v61  ;;  %v4788_v38 = vld [vmem:[#allocation8_spill] sm:$0xff] }
 0x2bb   : > { %v2583_v23 = vpop.f32.mrf.mxu0 }
 0x2bc   : > { %v2872_v58 = vpop.f32.mrf.mxu1  ;;  %3787 = vrsqrt.f32 %v2868_v36  ;;  %v2584_v50 = vadd.f32 %v2583_v23, %v4407_v31 }
 0x2bd   : > { %v3782_v45 = vpop.eup %3781  ;;  %v2585_v21 = vpop.f32.mrf.mxu0 }
 0x2be   : > { %v2874_v19 = vpop.f32.mrf.mxu1  ;;  %3275 = vst.msk [vmem:[%s4535_s20 + $0x100] sm:$0xff] %vm3242_vm0, %v3782_v45  ;;  %v2873_v29 = vadd.f32 %v2872_v58, %v2584_v50  ;;  %v4789_v21 = vld [vmem:[#allocation9_spill] sm:$0xff] }
 0x2bf   : > { %v2586_v48 = vpop.f32.mrf.mxu0 }
 0x2c0   : > { %v2875_v11 = vpop.f32.mrf.mxu1  ;;  %3789 = vrsqrt.f32 %v2873_v29  ;;  %v2587_v20 = vadd.f32 %v2586_v48, %v4413_v52 }
 0x2c1   : > { %v3784_v4 = vpop.eup %3783  ;;  %v2588_v32 = vpop.f32.mrf.mxu0 }
 0x2c2   : > { %v2877_v25 = vpop.f32.mrf.mxu1  ;;  %3276 = vst.msk [vmem:[%s4535_s20 + $0x108] sm:$0xff] %vm3242_vm0, %v3784_v4  ;;  %v2876_v3 = vadd.f32 %v2875_v11, %v2587_v20 }
 0x2c3   : > { %v2591_v14 = vpop.f32.mrf.mxu0  ;;  %v4790_v25 = vld [vmem:[#allocation10_spill] sm:$0xff] }
 0x2c4   : > { %v2880_v31 = vpop.f32.mrf.mxu1  ;;  %3791 = vrsqrt.f32 %v2876_v3  ;;  %v2592_v1 = vadd.f32 %v2591_v14, %v4415_v13 }
 0x2c5   : > { %v3786_v22 = vpop.eup %3785  ;;  %v2593_v15 = vpop.f32.mrf.mxu0 }
 0x2c6   : > { %v2882_v43 = vpop.f32.mrf.mxu1  ;;  %3277 = vst.msk [vmem:[%s4535_s20 + $0x110] sm:$0xff] %vm3242_vm0, %v3786_v22  ;;  %v2881_v46 = vadd.f32 %v2880_v31, %v2592_v1 }
 0x2c7   : > { %v2594_v27 = vpop.f32.mrf.mxu0 }
 0x2c8   : > { %v2883_v52 = vpop.f32.mrf.mxu1  ;;  %3793 = vrsqrt.f32 %v2881_v46  ;;  %v2595_v39 = vadd.f32 %v2594_v27, %v4421_v24  ;;  %v4791_v46 = vld [vmem:[#allocation11_spill] sm:$0xff] }
 0x2c9   : > { %v3788_v42 = vpop.eup %3787  ;;  %v2596_v51 = vpop.f32.mrf.mxu0 }
 0x2ca   : > { %v2885_v33 = vpop.f32.mrf.mxu1  ;;  %3278 = vst.msk [vmem:[%s4535_s20 + $0x118] sm:$0xff] %vm3242_vm0, %v3788_v42  ;;  %v2884_v60 = vadd.f32 %v2883_v52, %v2595_v39 }
 0x2cb   : > { %v2599_v53 = vpop.f32.mrf.mxu0 }
 0x2cc   : > { %v2888_v13 = vpop.f32.mrf.mxu1  ;;  %3795 = vrsqrt.f32 %v2884_v60  ;;  %v2600_v57 = vadd.f32 %v2599_v53, %v4423_v63  ;;  %v4792_v53 = vld [vmem:[#allocation12_spill] sm:$0xff] }
 0x2cd   : > { %v3790_v26 = vpop.eup %3789  ;;  %v2601_v30 = vpop.f32.mrf.mxu0 }
 0x2ce   : > { %v2890_v49 = vpop.f32.mrf.mxu1  ;;  %3279 = vst.msk [vmem:[%s4535_s20 + $0x120] sm:$0xff] %vm3242_vm0, %v3790_v26  ;;  %v2889_v44 = vadd.f32 %v2888_v13, %v2600_v57 }
 0x2cf   : > { %v2602_v7 = vpop.f32.mrf.mxu0 }
 0x2d0   : > { %v2891_v24 = vpop.f32.mrf.mxu1  ;;  %3797 = vrsqrt.f32 %v2889_v44  ;;  %v2603_v41 = vadd.f32 %v2602_v7, %v4429_v28 }
 0x2d1   : > { %v3792_v8 = vpop.eup %3791  ;;  %v2604_v12 = vpop.f32.mrf.mxu0 }
 0x2d2   : > { %v2893_v10 = vpop.f32.mrf.mxu1  ;;  %3280 = vst.msk [vmem:[%s4535_s20 + $0x128] sm:$0xff] %vm3242_vm0, %v3792_v8  ;;  %v2892_v16 = vadd.f32 %v2891_v24, %v2603_v41  ;;  %v4793_v24 = vld [vmem:[#allocation13_spill] sm:$0xff] }
 0x2d3   : > { %v2607_v2 = vpop.f32.mrf.mxu0 }
 0x2d4   : > { %v2896_v63 = vpop.f32.mrf.mxu1  ;;  %3799 = vrsqrt.f32 %v2892_v16  ;;  %v2608_v62 = vadd.f32 %v2607_v2, %v4786_v34  ;;  %v4794_v34 = vld [vmem:[#allocation14_spill] sm:$0xff] }
 0x2d5   : > { %v3794_v59 = vpop.eup %3793  ;;  %v2609_v6 = vpop.f32.mrf.mxu0 }
 0x2d6   : > { %v2898_v0 = vpop.f32.mrf.mxu1  ;;  %3281 = vst.msk [vmem:[%s4535_s20 + $0x130] sm:$0xff] %vm3242_vm0, %v3794_v59  ;;  %v2897_v40 = vadd.f32 %v2896_v63, %v2608_v62 }
 0x2d7   : > { %v2610_v17 = vpop.f32.mrf.mxu0 }
 0x2d8   : > { %v2899_v28 = vpop.f32.mrf.mxu1  ;;  %3801 = vrsqrt.f32 %v2897_v40  ;;  %v2611_v5 = vadd.f32 %v2610_v17, %v4787_v47  ;;  %v4795_v47 = vld [vmem:[#allocation15_spill] sm:$0xff] }
 0x2d9   : > { %v3796_v54 = vpop.eup %3795  ;;  %v2612_v9 = vpop.f32.mrf.mxu0 }
 0x2da   : > { %v2901_v55 = vpop.f32.mrf.mxu1  ;;  %3282 = vst.msk [vmem:[%s4535_s20 + $0x138] sm:$0xff] %vm3242_vm0, %v3796_v54  ;;  %v2900_v37 = vadd.f32 %v2899_v28, %v2611_v5 }
 0x2db   : > { %v2615_v35 = vpop.f32.mrf.mxu0 }
 0x2dc   : > { %v2904_v61 = vpop.f32.mrf.mxu1  ;;  %3803 = vrsqrt.f32 %v2900_v37  ;;  %v2616_v18 = vadd.f32 %v2615_v35, %v4788_v38  ;;  %v4796_v38 = vld [vmem:[#allocation16_spill] sm:$0xff] }
 0x2dd   : > { %v3798_v56 = vpop.eup %3797  ;;  %v2617_v36 = vpop.f32.mrf.mxu0 }
 0x2de   : > { %v2906_v23 = vpop.f32.mrf.mxu1  ;;  %3283 = vst.msk [vmem:[%s4535_s20 + $0x140] sm:$0xff] %vm3242_vm0, %v3798_v56  ;;  %v2905_v58 = vadd.f32 %v2904_v61, %v2616_v18 }
 0x2df   : > { %v2618_v50 = vpop.f32.mrf.mxu0 }
 0x2e0   : > { %v2907_v45 = vpop.f32.mrf.mxu1  ;;  %3805 = vrsqrt.f32 %v2905_v58  ;;  %v2619_v19 = vadd.f32 %v2618_v50, %v4789_v21  ;;  %v4797_v21 = vld [vmem:[#allocation17_spill] sm:$0xff] }
 0x2e1   : > { %v3800_v29 = vpop.eup %3799  ;;  %v2620_v48 = vpop.f32.mrf.mxu0 }
 0x2e2   : > { %v2909_v11 = vpop.f32.mrf.mxu1  ;;  %3284 = vst.msk [vmem:[%s4535_s20 + $0x148] sm:$0xff] %vm3242_vm0, %v3800_v29  ;;  %v2908_v20 = vadd.f32 %v2907_v45, %v2619_v19 }
 0x2e3   : > { %v2623_v4 = vpop.f32.mrf.mxu0 }
 0x2e4   : > { %v2912_v32 = vpop.f32.mrf.mxu1  ;;  %3807 = vrsqrt.f32 %v2908_v20  ;;  %v2624_v3 = vadd.f32 %v2623_v4, %v4790_v25  ;;  %v4798_v25 = vld [vmem:[#allocation18_spill] sm:$0xff] }
 0x2e5   : > { %v3802_v14 = vpop.eup %3801  ;;  %v2625_v31 = vpop.f32.mrf.mxu0 }
 0x2e6   : > { %v2914_v1 = vpop.f32.mrf.mxu1  ;;  %3285 = vst.msk [vmem:[%s4535_s20 + $0x150] sm:$0xff] %vm3242_vm0, %v3802_v14  ;;  %v2913_v22 = vadd.f32 %v2912_v32, %v2624_v3 }
 0x2e7   : > { %v2626_v15 = vpop.f32.mrf.mxu0 }
 0x2e8   : > { %v2915_v43 = vpop.f32.mrf.mxu1  ;;  %3809 = vrsqrt.f32 %v2913_v22  ;;  %v2627_v27 = vadd.f32 %v2626_v15, %v4791_v46  ;;  %v4799_v46 = vld [vmem:[#allocation19_spill] sm:$0xff] }
 0x2e9   : > { %v3804_v52 = vpop.eup %3803  ;;  %v2628_v39 = vpop.f32.mrf.mxu0 }
 0x2ea   : > { %v2917_v42 = vpop.f32.mrf.mxu1  ;;  %3286 = vst.msk [vmem:[%s4535_s20 + $0x158] sm:$0xff] %vm3242_vm0, %v3804_v52  ;;  %v2916_v51 = vadd.f32 %v2915_v43, %v2627_v27 }
 0x2eb   : > { %v2631_v33 = vpop.f32.mrf.mxu0 }
 0x2ec   : > { %v2920_v60 = vpop.f32.mrf.mxu1  ;;  %3811 = vrsqrt.f32 %v2916_v51  ;;  %v2632_v13 = vadd.f32 %v2631_v33, %v4792_v53  ;;  %v4800_v53 = vld [vmem:[#allocation20_spill] sm:$0xff] }
 0x2ed   : > { %v3806_v57 = vpop.eup %3805  ;;  %v2633_v26 = vpop.f32.mrf.mxu0 }
 0x2ee   : > { %v2922_v30 = vpop.f32.mrf.mxu1  ;;  %3287 = vst.msk [vmem:[%s4535_s20 + $0x160] sm:$0xff] %vm3242_vm0, %v3806_v57  ;;  %v2921_v49 = vadd.f32 %v2920_v60, %v2632_v13 }
 0x2ef   : > { %v2634_v44 = vpop.f32.mrf.mxu0 }
 0x2f0   : > { %v2923_v7 = vpop.f32.mrf.mxu1  ;;  %3813 = vrsqrt.f32 %v2921_v49  ;;  %v2635_v41 = vadd.f32 %v2634_v44, %v4793_v24  ;;  %v4801_v24 = vld [vmem:[#allocation21_spill] sm:$0xff] }
 0x2f1   : > { %v3808_v8 = vpop.eup %3807  ;;  %v2636_v12 = vpop.f32.mrf.mxu0 }
 0x2f2   : > { %v2925_v10 = vpop.f32.mrf.mxu1  ;;  %3288 = vst.msk [vmem:[%s4535_s20 + $0x168] sm:$0xff] %vm3242_vm0, %v3808_v8  ;;  %v2924_v16 = vadd.f32 %v2923_v7, %v2635_v41 }
 0x2f3   : > { %v2639_v2 = vpop.f32.mrf.mxu0 }
 0x2f4   : > { %v2928_v63 = vpop.f32.mrf.mxu1  ;;  %3815 = vrsqrt.f32 %v2924_v16  ;;  %v2640_v62 = vadd.f32 %v2639_v2, %v4794_v34  ;;  %v4802_v34 = vld [vmem:[#allocation22_spill] sm:$0xff] }
 0x2f5   : > { %v3810_v59 = vpop.eup %3809  ;;  %v2641_v6 = vpop.f32.mrf.mxu0 }
 0x2f6   : > { %v2930_v0 = vpop.f32.mrf.mxu1  ;;  %3289 = vst.msk [vmem:[%s4535_s20 + $0x170] sm:$0xff] %vm3242_vm0, %v3810_v59  ;;  %v2929_v40 = vadd.f32 %v2928_v63, %v2640_v62 }
 0x2f7   : > { %v2642_v17 = vpop.f32.mrf.mxu0 }
 0x2f8   : > { %v2931_v28 = vpop.f32.mrf.mxu1  ;;  %3817 = vrsqrt.f32 %v2929_v40  ;;  %v2643_v5 = vadd.f32 %v2642_v17, %v4795_v47  ;;  %v4803_v47 = vld [vmem:[#allocation23_spill] sm:$0xff] }
 0x2f9   : > { %v3812_v54 = vpop.eup %3811  ;;  %v2644_v9 = vpop.f32.mrf.mxu0 }
 0x2fa   : > { %v2933_v55 = vpop.f32.mrf.mxu1  ;;  %3290 = vst.msk [vmem:[%s4535_s20 + $0x178] sm:$0xff] %vm3242_vm0, %v3812_v54  ;;  %v2932_v37 = vadd.f32 %v2931_v28, %v2643_v5 }
 0x2fb   : > { %v2647_v35 = vpop.f32.mrf.mxu0 }
 0x2fc   : > { %v2936_v61 = vpop.f32.mrf.mxu1  ;;  %3819 = vrsqrt.f32 %v2932_v37  ;;  %v2648_v18 = vadd.f32 %v2647_v35, %v4796_v38  ;;  %v4804_v38 = vld [vmem:[#allocation24_spill] sm:$0xff] }
 0x2fd   : > { %v3814_v56 = vpop.eup %3813  ;;  %v2649_v36 = vpop.f32.mrf.mxu0 }
 0x2fe   : > { %v2938_v23 = vpop.f32.mrf.mxu1  ;;  %3291 = vst.msk [vmem:[%s4535_s20 + $0x180] sm:$0xff] %vm3242_vm0, %v3814_v56  ;;  %v2937_v58 = vadd.f32 %v2936_v61, %v2648_v18 }
 0x2ff   : > { %v2650_v50 = vpop.f32.mrf.mxu0 }
 0x300   : > { %v2939_v45 = vpop.f32.mrf.mxu1  ;;  %3821 = vrsqrt.f32 %v2937_v58  ;;  %v2651_v19 = vadd.f32 %v2650_v50, %v4797_v21  ;;  %v4805_v21 = vld [vmem:[#allocation25_spill] sm:$0xff] }
 0x301   : > { %v3816_v29 = vpop.eup %3815  ;;  %v2652_v48 = vpop.f32.mrf.mxu0 }
 0x302   : > { %v2941_v11 = vpop.f32.mrf.mxu1  ;;  %3292 = vst.msk [vmem:[%s4535_s20 + $0x188] sm:$0xff] %vm3242_vm0, %v3816_v29  ;;  %v2940_v20 = vadd.f32 %v2939_v45, %v2651_v19 }
 0x303   : > { %v2655_v4 = vpop.f32.mrf.mxu0 }
 0x304   : > { %v2944_v32 = vpop.f32.mrf.mxu1  ;;  %3823 = vrsqrt.f32 %v2940_v20  ;;  %v2656_v3 = vadd.f32 %v2655_v4, %v4798_v25  ;;  %v4806_v25 = vld [vmem:[#allocation26_spill] sm:$0xff] }
 0x305   : > { %v3818_v14 = vpop.eup %3817  ;;  %v2657_v31 = vpop.f32.mrf.mxu0 }
 0x306   : > { %v2946_v1 = vpop.f32.mrf.mxu1  ;;  %3293 = vst.msk [vmem:[%s4535_s20 + $0x190] sm:$0xff] %vm3242_vm0, %v3818_v14  ;;  %v2945_v22 = vadd.f32 %v2944_v32, %v2656_v3 }
 0x307   : > { %v2658_v15 = vpop.f32.mrf.mxu0 }
 0x308   : > { %v2947_v43 = vpop.f32.mrf.mxu1  ;;  %3825 = vrsqrt.f32 %v2945_v22  ;;  %v2659_v27 = vadd.f32 %v2658_v15, %v4799_v46  ;;  %v4807_v46 = vld [vmem:[#allocation27_spill] sm:$0xff] }
 0x309   : > { %v3820_v52 = vpop.eup %3819  ;;  %v2660_v39 = vpop.f32.mrf.mxu0 }
 0x30a   : > { %v2949_v42 = vpop.f32.mrf.mxu1  ;;  %3294 = vst.msk [vmem:[%s4535_s20 + $0x198] sm:$0xff] %vm3242_vm0, %v3820_v52  ;;  %v2948_v51 = vadd.f32 %v2947_v43, %v2659_v27 }
 0x30b   : > { %v2663_v33 = vpop.f32.mrf.mxu0 }
 0x30c   : > { %v2952_v60 = vpop.f32.mrf.mxu1  ;;  %3827 = vrsqrt.f32 %v2948_v51  ;;  %v2664_v13 = vadd.f32 %v2663_v33, %v4800_v53 }
 0x30d   : > { %v3822_v57 = vpop.eup %3821  ;;  %v2665_v26 = vpop.f32.mrf.mxu0 }
 0x30e   : > { %v2954_v30 = vpop.f32.mrf.mxu1  ;;  %3295 = vst.msk [vmem:[%s4535_s20 + $0x1a0] sm:$0xff] %vm3242_vm0, %v3822_v57  ;;  %v2953_v49 = vadd.f32 %v2952_v60, %v2664_v13 }
 0x30f   : > { %v2666_v44 = vpop.f32.mrf.mxu0 }
 0x310   : > { %v2955_v7 = vpop.f32.mrf.mxu1  ;;  %3829 = vrsqrt.f32 %v2953_v49  ;;  %v2667_v41 = vadd.f32 %v2666_v44, %v4801_v24 }
 0x311   : > { %v3824_v8 = vpop.eup %3823  ;;  %v2668_v12 = vpop.f32.mrf.mxu0 }
 0x312   : > { %v2957_v10 = vpop.f32.mrf.mxu1  ;;  %3296 = vst.msk [vmem:[%s4535_s20 + $0x1a8] sm:$0xff] %vm3242_vm0, %v3824_v8  ;;  %v2956_v16 = vadd.f32 %v2955_v7, %v2667_v41 }
 0x313   : > { %v2671_v2 = vpop.f32.mrf.mxu0 }
 0x314   : > { %v2960_v63 = vpop.f32.mrf.mxu1  ;;  %3831 = vrsqrt.f32 %v2956_v16  ;;  %v2672_v62 = vadd.f32 %v2671_v2, %v4802_v34 }
 0x315   : > { %v3826_v59 = vpop.eup %3825  ;;  %v2673_v6 = vpop.f32.mrf.mxu0 }
 0x316   : > { %v2962_v0 = vpop.f32.mrf.mxu1  ;;  %3297 = vst.msk [vmem:[%s4535_s20 + $0x1b0] sm:$0xff] %vm3242_vm0, %v3826_v59  ;;  %v2961_v40 = vadd.f32 %v2960_v63, %v2672_v62 }
 0x317   : > { %v2674_v17 = vpop.f32.mrf.mxu0 }
 0x318   : > { %v2963_v28 = vpop.f32.mrf.mxu1  ;;  %3833 = vrsqrt.f32 %v2961_v40  ;;  %v2675_v5 = vadd.f32 %v2674_v17, %v4803_v47 }
 0x319   : > { %v3828_v54 = vpop.eup %3827  ;;  %v2676_v9 = vpop.f32.mrf.mxu0 }
 0x31a   : > { %v2965_v55 = vpop.f32.mrf.mxu1  ;;  %3298 = vst.msk [vmem:[%s4535_s20 + $0x1b8] sm:$0xff] %vm3242_vm0, %v3828_v54  ;;  %v2964_v37 = vadd.f32 %v2963_v28, %v2675_v5 }
 0x31b   : > { %v2679_v35 = vpop.f32.mrf.mxu0 }
 0x31c   : > { %v2968_v61 = vpop.f32.mrf.mxu1  ;;  %3835 = vrsqrt.f32 %v2964_v37  ;;  %v2680_v18 = vadd.f32 %v2679_v35, %v4804_v38 }
 0x31d   : > { %v3830_v56 = vpop.eup %3829  ;;  %v2681_v36 = vpop.f32.mrf.mxu0 }
 0x31e   : > { %v2970_v23 = vpop.f32.mrf.mxu1  ;;  %3299 = vst.msk [vmem:[%s4535_s20 + $0x1c0] sm:$0xff] %vm3242_vm0, %v3830_v56  ;;  %v2969_v58 = vadd.f32 %v2968_v61, %v2680_v18 }
 0x31f   : > { %v2682_v50 = vpop.f32.mrf.mxu0 }
 0x320   : > { %v2971_v45 = vpop.f32.mrf.mxu1  ;;  %3837 = vrsqrt.f32 %v2969_v58  ;;  %v2683_v19 = vadd.f32 %v2682_v50, %v4805_v21 }
 0x321   : > { %v3832_v29 = vpop.eup %3831  ;;  %v2684_v48 = vpop.f32.mrf.mxu0 }
 0x322   : > { %v2973_v11 = vpop.f32.mrf.mxu1  ;;  %3300 = vst.msk [vmem:[%s4535_s20 + $0x1c8] sm:$0xff] %vm3242_vm0, %v3832_v29  ;;  %v2972_v20 = vadd.f32 %v2971_v45, %v2683_v19 }
 0x323   : > { %v2687_v4 = vpop.f32.mrf.mxu0 }
 0x324   : > { %v2976_v32 = vpop.f32.mrf.mxu1  ;;  %3839 = vrsqrt.f32 %v2972_v20  ;;  %v2688_v3 = vadd.f32 %v2687_v4, %v4806_v25 }
 0x325   : > { %v3834_v14 = vpop.eup %3833  ;;  %v2689_v31 = vpop.f32.mrf.mxu0 }
 0x326   : > { %v2978_v1 = vpop.f32.mrf.mxu1  ;;  %3301 = vst.msk [vmem:[%s4535_s20 + $0x1d0] sm:$0xff] %vm3242_vm0, %v3834_v14  ;;  %v2977_v22 = vadd.f32 %v2976_v32, %v2688_v3 }
 0x327   : > { %v2690_v15 = vpop.f32.mrf.mxu0 }
 0x328   : > { %v2979_v43 = vpop.f32.mrf.mxu1  ;;  %3841 = vrsqrt.f32 %v2977_v22  ;;  %v2691_v27 = vadd.f32 %v2690_v15, %v4807_v46 }
 0x329   : > { %v3836_v52 = vpop.eup %3835  ;;  %v2692_v39 = vpop.f32.mrf.mxu0 }
 0x32a   : > { %v2981_v42 = vpop.f32.mrf.mxu1  ;;  %3302 = vst.msk [vmem:[%s4535_s20 + $0x1d8] sm:$0xff] %vm3242_vm0, %v3836_v52  ;;  %v2980_v51 = vadd.f32 %v2979_v43, %v2691_v27 }
 0x32c   : > { %3843 = vrsqrt.f32 %v2980_v51 }
 0x32d   : > { %v3838_v33 = vpop.eup %3837 }
 0x32e   : > { %3303 = vst.msk [vmem:[%s4535_s20 + $0x1e0] sm:$0xff] %vm3242_vm0, %v3838_v33 }
 0x331   : > { %v3840_v60 = vpop.eup %3839 }
 0x332   : > { %3304 = vst.msk [vmem:[%s4535_s20 + $0x1e8] sm:$0xff] %vm3242_vm0, %v3840_v60 }
 0x335   : > { %v3842_v53 = vpop.eup %3841 }
 0x336   : > { %3305 = vst.msk [vmem:[%s4535_s20 + $0x1f0] sm:$0xff] %vm3242_vm0, %v3842_v53 }
 0x339   : > { %v3844_v13 = vpop.eup %3843 }
 0x33a   : > { %3306 = vst.msk [vmem:[%s4535_s20 + $0x1f8] sm:$0xff] %vm3242_vm0, %v3844_v13 }
 0x33b PF: > { %s14_s11 = sadd.s32 1, %s3923_s11   ;;  %s4808_s6 = smov %s3907_s7 }
 0x33c   : > { %p11_p8 = scmp.ge.s32.totalorder %s14_s11, 4   ;;  %s4809_s7 = smov %s3911_s8 }
 0x33d   : > { %s4810_s8 = smov %s3989_s18  ;;  %s4811_s9 = smov %s3919_s10 }
 0x33e   : > { %s4812_s10 = smov %s4814_s13  ;;  %13 = sbr.rel (!%p11_p8) target bundleno = 4 (0x4), region = 72 }
 0x343   :  { %3329 = vsyncpa [#allocation4], 1 }
 0x344   :  { %3331 = vsyncpa [#allocation4 + $0x1], 1 }

</bundles_post_ra>
